<compile_context>
chip_gen: v7x
topology: tpu7x:2x2x1
jax: 0.10.0
libtpu: 0.0.40
codegen_flags: <defaults>
</compile_context>

<pallas_src>
import jax
import jax.numpy as jnp
from jax.experimental import pallas as pl
from jax.experimental.pallas import tpu as pltpu


def _round_up(v, m):
    return (v + m - 1) // m * m


def mlpg_kernel(x_ref, w1_ref, wstack_ref, w5_ref, bstack_ref, b5_ref, out_ref):
    f32, bf16 = jnp.float32, jnp.bfloat16
    Bt, N, Dp = x_ref.shape
    Hp = w1_ref.shape[1]
    rows = Bt * N

    # Flatten the Bt clouds into one row slab so every MXU pass sees Bt*N rows.
    x = x_ref[...].reshape(rows, Dp)                       # bf16

    b2 = bstack_ref[0:1, :]                                # (1, Hp) f32
    b3 = bstack_ref[1:2, :]
    b4 = bstack_ref[2:3, :]

    # fc1 + relu  (b1 is folded into the ones column of x / row D of w1)
    h = jnp.dot(x, w1_ref[...], preferred_element_type=f32)
    h = jnp.maximum(h, 0.0)
    # fc2 + relu
    h = jnp.dot(h.astype(bf16), wstack_ref[0], preferred_element_type=f32) + b2
    h = jnp.maximum(h, 0.0)
    # fc3 + relu
    h = jnp.dot(h.astype(bf16), wstack_ref[1], preferred_element_type=f32) + b3
    h = jnp.maximum(h, 0.0)

    # Exact per-cloud global max over the point dimension.
    g = jnp.max(h.reshape(Bt, N, Hp), axis=1)              # (Bt, Hp) f32

    # torch.cat((h, g.repeat(N,1)), -1) @ W4.T + b4  ==  h @ W4a + g @ W4b + b4
    gw = jnp.dot(g.astype(bf16), wstack_ref[3], preferred_element_type=f32)   # (Bt, Hp)
    z = jnp.dot(h.astype(bf16), wstack_ref[2], preferred_element_type=f32) + b4  # (rows, Hp)
    z = z.reshape(Bt, N, Hp) + gw[:, None, :]              # per-cloud broadcast of the g term
    z = jnp.maximum(z, 0.0).reshape(rows, Hp)

    # fc5 (no activation); only the real out_dim columns are computed and stored.
    out = jnp.dot(z.astype(bf16), w5_ref[...], preferred_element_type=f32) + b5_ref[...]
    out_ref[...] = out.reshape(Bt, N, -1).astype(out_ref.dtype)


def _pick_clouds_per_step(B, N, row_bytes, vmem_budget_bytes=16 << 20):
    """Largest divisor of B whose rows-per-step fit a conservative VMEM budget,
    preferring >= 2 grid steps so both v7x TensorCores get work."""
    divisors = [d for d in range(1, B + 1) if B % d == 0]
    fits = [d for d in divisors if d * N * row_bytes <= vmem_budget_bytes] or [1]
    two_step = [d for d in fits if B // d >= 2]
    return max(two_step) if two_step else max(fits)


def mlpg_forward(x, params):
    """x: (B, N, in_dim) float32 batch of point clouds (or (N, in_dim) single cloud).
    Each cloud is processed exactly like the PyTorch module (global max per cloud).
    Returns (B, N, out_dim) float32 (or (N, out_dim))."""
    if x.ndim == 2:
        return mlpg_forward(x[None], params)[0]

    B, N, D = x.shape
    H = params["w2"].shape[0]
    O = params["w5"].shape[0]

    f32, bf16 = jnp.float32, jnp.bfloat16
    Dp = _round_up(D + 1, 16)      # +1 ones column for folded b1; 16 = bf16 sublane pack
    Hp = _round_up(H, 128)         # lane-dense hidden activations

    # Leading-dim reshapes inside the kernel want N on a clean sublane tile.  Padding N
    # is NOT semantics-preserving here (zero rows would feed relu(b1)-derived values
    # into the per-cloud max), so we require it instead.
    assert N % 16 == 0, "this kernel requires the point count per cloud to be a multiple of 16"

    def padw(w, rows, cols):
        w = w.astype(f32)
        return jnp.pad(w, ((0, rows - w.shape[0]), (0, cols - w.shape[1]))).astype(bf16)

    def padb(bvec, cols):
        return jnp.pad(bvec.astype(f32), (0, cols - bvec.shape[0]))

    # PyTorch nn.Linear convention: weight is (out, in) -> transpose to (in, out), zero-pad.
    w1p = padw(params["w1"].T, Dp, Hp)
    w1p = w1p.at[D, :H].set(params["b1"].astype(bf16))      # b1 folded via ones column
    w2p = padw(params["w2"].T, Hp, Hp)
    w3p = padw(params["w3"].T, Hp, Hp)
    w4 = params["w4"].T                                     # (2H, H)
    w4ap = padw(w4[:H, :], Hp, Hp)                          # multiplies h
    w4bp = padw(w4[H:, :], Hp, Hp)                          # multiplies g
    w5p = padw(params["w5"].T, Hp, O)                       # real out_dim columns (unpadded)

    wstack = jnp.stack([w2p, w3p, w4ap, w4bp], axis=0)      # (4, Hp, Hp) bf16 -> one DMA
    bstack = jnp.stack([padb(params["b2"], Hp), padb(params["b3"], Hp),
                        padb(params["b4"], Hp)], axis=0)    # (3, Hp) f32
    b5p = params["b5"].astype(f32)[None, :]                 # (1, O)  f32

    xp = jnp.pad(x.astype(bf16), ((0, 0), (0, 0), (0, Dp - D)))
    xp = xp.at[:, :, D].set(jnp.asarray(1.0, bf16))         # ones column -> fc1 bias

    # Rough per-row VMEM footprint: double-buffered x/out blocks + live f32 temporaries.
    row_bytes = 2 * (2 * Dp + 4 * O) + 3 * 4 * Hp
    Bt = _pick_clouds_per_step(B, N, row_bytes)
    grid = (B // Bt,)

    flops = 2 * B * N * (Dp * Hp + 3 * Hp * Hp + Hp * O) + 2 * B * Hp * Hp
    bytes_accessed = (2 * xp.size + 2 * (w1p.size + wstack.size + w5p.size)
                      + 4 * (bstack.size + b5p.size) + 4 * B * N * O)

    def run(weight_pipeline_mode):
        def const_spec(shape):
            ndim = len(shape)
            kwargs = {}
            if weight_pipeline_mode is not None:
                kwargs["pipeline_mode"] = weight_pipeline_mode
            return pl.BlockSpec(shape, lambda i: (0,) * ndim, **kwargs)

        return pl.pallas_call(
            mlpg_kernel,
            out_shape=jax.ShapeDtypeStruct((B, N, O), f32),
            grid=grid,
            in_specs=[
                pl.BlockSpec((Bt, N, Dp), lambda i: (i, 0, 0)),   # Bt clouds per step
                const_spec((Dp, Hp)),                             # VMEM-resident weights,
                const_spec((4, Hp, Hp)),                          #   constant block index
                const_spec((Hp, O)),
                const_spec((3, Hp)),
                const_spec((1, O)),
            ],
            out_specs=pl.BlockSpec((Bt, N, O), lambda i: (i, 0, 0)),
            compiler_params=pltpu.CompilerParams(
                dimension_semantics=("parallel",)),               # megacore / 2nd TC on v7x
            cost_estimate=pl.CostEstimate(flops=flops, transcendentals=0,
                                          bytes_accessed=bytes_accessed),
        )(xp, w1p, wstack, w5p, bstack, b5p)

    try:
        # Constant-index weights only need one buffer (default pipelining allocates two;
        # at realistic H=1024 that is 16 -> 32 MiB of wasted VMEM).
        out = jax.block_until_ready(run(pl.Buffered(1)))
    except Exception:
        # Fallback if this jax build rejects pipeline_mode on the TPU pallas_call pipeline.
        out = jax.block_until_ready(run(None))
    return out


def mlpg_reference_single(x, params):
    """Pure-JAX f32 reference mirroring the PyTorch forward exactly (one cloud)."""
    relu = lambda t: jnp.maximum(t, 0.0)
    h = relu(x @ params["w1"].T + params["b1"])
    h = relu(h @ params["w2"].T + params["b2"])
    h = relu(h @ params["w3"].T + params["b3"])
    g = jnp.max(h, axis=0, keepdims=True)
    g = jnp.repeat(g, h.shape[0], axis=0)
    h = jnp.concatenate((h, g), axis=-1)
    h = relu(h @ params["w4"].T + params["b4"])
    return h @ params["w5"].T + params["b5"]


def init_params(key, in_dim, hidden, out_dim):
    """Deterministic synthetic init with PyTorch nn.Linear conventions (weight = (out, in))."""
    ks = jax.random.split(key, 10)

    def lin(kw, kb, fan_in, fan_out):
        bound = 1.0 / jnp.sqrt(fan_in)
        w = jax.random.uniform(kw, (fan_out, fan_in), jnp.float32, -bound, bound)
        b = jax.random.uniform(kb, (fan_out,), jnp.float32, -bound, bound)
        return w, b

    w1, b1 = lin(ks[0], ks[1], in_dim, hidden)
    w2, b2 = lin(ks[2], ks[3], hidden, hidden)
    w3, b3 = lin(ks[4], ks[5], hidden, hidden)
    w4, b4 = lin(ks[6], ks[7], hidden * 2, hidden)
    w5, b5 = lin(ks[8], ks[9], hidden, out_dim)
    return dict(w1=w1, b1=b1, w2=w2, b2=b2, w3=w3, b3=b3,
                w4=w4, b4=b4, w5=w5, b5=b5)


if __name__ == "__main__":
    key = jax.random.PRNGKey(0)
    k_x, k_p = jax.random.split(key)

    B, N, in_dim, hidden, out_dim = 4, 64, 3, 32, 16   # small shapes; batch of clouds
    x = jax.random.normal(k_x, (B, N, in_dim), jnp.float32)
    params = init_params(k_p, in_dim, hidden, out_dim)

    out = mlpg_forward(x, params)
    out = jax.block_until_ready(out)

    ref = jax.vmap(lambda xc: mlpg_reference_single(xc, params))(x)
    assert out.shape == (B, N, out_dim), out.shape
    # bf16 matmuls with f32 accumulation -> loosened tolerance vs the f32 reference.
    assert jnp.allclose(out, ref, atol=5e-2, rtol=5e-2), \
        float(jnp.max(jnp.abs(out - ref)))

    print("KERNEL_OK")
</pallas_src>

<mosaic_0001>
module attributes {stable_mosaic.version = 11 : i64} {
  func.func @mlpg_kernel(%arg0: i32, %arg1: memref<2x64x16xbf16, #tpu.memory_space<vmem>>, %arg2: memref<16x128xbf16, #tpu.memory_space<vmem>>, %arg3: memref<4x128x128xbf16, #tpu.memory_space<vmem>>, %arg4: memref<128x16xbf16, #tpu.memory_space<vmem>>, %arg5: memref<3x128xf32, #tpu.memory_space<vmem>>, %arg6: memref<1x16xf32, #tpu.memory_space<vmem>>, %arg7: memref<2x64x16xf32, #tpu.memory_space<vmem>>) attributes {dimension_semantics = [#tpu.dimension_semantics<parallel>], iteration_bounds = array<i64: 2>, scalar_prefetch = 0 : i64, scratch_operands = 0 : i64, tpu.core_type = #tpu.core_type<tc>, window_params = [{transform_indices = @transform_0, window_bounds = array<i64: 2, 64, 16>}, {pipeline_mode = #tpu.pipeline_mode<synchronous>, transform_indices = @transform_1, window_bounds = array<i64: 16, 128>}, {pipeline_mode = #tpu.pipeline_mode<synchronous>, transform_indices = @transform_2, window_bounds = array<i64: 4, 128, 128>}, {pipeline_mode = #tpu.pipeline_mode<synchronous>, transform_indices = @transform_3, window_bounds = array<i64: 128, 16>}, {pipeline_mode = #tpu.pipeline_mode<synchronous>, transform_indices = @transform_4, window_bounds = array<i64: 3, 128>}, {pipeline_mode = #tpu.pipeline_mode<synchronous>, transform_indices = @transform_5, window_bounds = array<i64: 1, 16>}, {transform_indices = @transform_6, window_bounds = array<i64: 2, 64, 16>}]} {
    %c0 = arith.constant 0 : index
    %c0_0 = arith.constant 0 : index
    %c0_1 = arith.constant 0 : index
    %0 = vector.load %arg1[%c0, %c0_0, %c0_1] : memref<2x64x16xbf16, #tpu.memory_space<vmem>>, vector<2x64x16xbf16>
    %1 = vector.shape_cast %0 : vector<2x64x16xbf16> to vector<128x16xbf16>
    %c0_2 = arith.constant 0 : index
    %c0_3 = arith.constant 0 : index
    %2 = vector.load %arg5[%c0_2, %c0_3] : memref<3x128xf32, #tpu.memory_space<vmem>>, vector<1x128xf32>
    %c1 = arith.constant 1 : index
    %c0_4 = arith.constant 0 : index
    %3 = vector.load %arg5[%c1, %c0_4] : memref<3x128xf32, #tpu.memory_space<vmem>>, vector<1x128xf32>
    %c2 = arith.constant 2 : index
    %c0_5 = arith.constant 0 : index
    %4 = vector.load %arg5[%c2, %c0_5] : memref<3x128xf32, #tpu.memory_space<vmem>>, vector<1x128xf32>
    %c0_6 = arith.constant 0 : index
    %c0_7 = arith.constant 0 : index
    %5 = vector.load %arg2[%c0_6, %c0_7] : memref<16x128xbf16, #tpu.memory_space<vmem>>, vector<16x128xbf16>
    %cst = arith.constant dense<0.000000e+00> : vector<128x128xf32>
    %6 = tpu.matmul %1, %5, %cst {dimension_numbers = #tpu.dot_dimension_numbers<[1], [0], [0], [1], [0, 0, 1, 1], [], []>} : vector<128x16xbf16>, vector<16x128xbf16>, vector<128x128xf32> -> vector<128x128xf32>
    %cst_8 = arith.constant 0.000000e+00 : f32
    %7 = vector.broadcast %cst_8 : f32 to vector<128x128xf32>
    %8 = arith.maximumf %6, %7 : vector<128x128xf32>
    %9 = arith.truncf %8 : vector<128x128xf32> to vector<128x128xbf16>
    %c0_9 = arith.constant 0 : index
    %c0_10 = arith.constant 0 : index
    %c0_11 = arith.constant 0 : index
    %10 = vector.load %arg3[%c0_9, %c0_10, %c0_11] : memref<4x128x128xbf16, #tpu.memory_space<vmem>>, vector<1x128x128xbf16>
    %11 = vector.shape_cast %10 : vector<1x128x128xbf16> to vector<128x128xbf16>
    %cst_12 = arith.constant dense<0.000000e+00> : vector<128x128xf32>
    %12 = tpu.matmul %9, %11, %cst_12 {dimension_numbers = #tpu.dot_dimension_numbers<[1], [0], [0], [1], [0, 0, 1, 1], [], []>} : vector<128x128xbf16>, vector<128x128xbf16>, vector<128x128xf32> -> vector<128x128xf32>
    %13 = vector.broadcast %2 : vector<1x128xf32> to vector<128x128xf32>
    %14 = arith.addf %12, %13 : vector<128x128xf32>
    %cst_13 = arith.constant 0.000000e+00 : f32
    %15 = vector.broadcast %cst_13 : f32 to vector<128x128xf32>
    %16 = arith.maximumf %14, %15 : vector<128x128xf32>
    %17 = arith.truncf %16 : vector<128x128xf32> to vector<128x128xbf16>
    %c1_14 = arith.constant 1 : index
    %c0_15 = arith.constant 0 : index
    %c0_16 = arith.constant 0 : index
    %18 = vector.load %arg3[%c1_14, %c0_15, %c0_16] : memref<4x128x128xbf16, #tpu.memory_space<vmem>>, vector<1x128x128xbf16>
    %19 = vector.shape_cast %18 : vector<1x128x128xbf16> to vector<128x128xbf16>
    %cst_17 = arith.constant dense<0.000000e+00> : vector<128x128xf32>
    %20 = tpu.matmul %17, %19, %cst_17 {dimension_numbers = #tpu.dot_dimension_numbers<[1], [0], [0], [1], [0, 0, 1, 1], [], []>} : vector<128x128xbf16>, vector<128x128xbf16>, vector<128x128xf32> -> vector<128x128xf32>
    %21 = vector.broadcast %3 : vector<1x128xf32> to vector<128x128xf32>
    %22 = arith.addf %20, %21 : vector<128x128xf32>
    %cst_18 = arith.constant 0.000000e+00 : f32
    %23 = vector.broadcast %cst_18 : f32 to vector<128x128xf32>
    %24 = arith.maximumf %22, %23 : vector<128x128xf32>
    %25 = vector.shape_cast %24 : vector<128x128xf32> to vector<2x64x128xf32>
    %cst_19 = arith.constant dense<0xFF800000> : vector<2x128xf32>
    %26 = vector.multi_reduction <maximumf>, %25, %cst_19 [1] : vector<2x64x128xf32> to vector<2x128xf32>
    %27 = arith.truncf %26 : vector<2x128xf32> to vector<2x128xbf16>
    %c3 = arith.constant 3 : index
    %c0_20 = arith.constant 0 : index
    %c0_21 = arith.constant 0 : index
    %28 = vector.load %arg3[%c3, %c0_20, %c0_21] : memref<4x128x128xbf16, #tpu.memory_space<vmem>>, vector<1x128x128xbf16>
    %29 = vector.shape_cast %28 : vector<1x128x128xbf16> to vector<128x128xbf16>
    %cst_22 = arith.constant dense<0.000000e+00> : vector<2x128xf32>
    %30 = tpu.matmul %27, %29, %cst_22 {dimension_numbers = #tpu.dot_dimension_numbers<[1], [0], [0], [1], [0, 0, 1, 1], [], []>} : vector<2x128xbf16>, vector<128x128xbf16>, vector<2x128xf32> -> vector<2x128xf32>
    %31 = arith.truncf %24 : vector<128x128xf32> to vector<128x128xbf16>
    %c2_23 = arith.constant 2 : index
    %c0_24 = arith.constant 0 : index
    %c0_25 = arith.constant 0 : index
    %32 = vector.load %arg3[%c2_23, %c0_24, %c0_25] : memref<4x128x128xbf16, #tpu.memory_space<vmem>>, vector<1x128x128xbf16>
    %33 = vector.shape_cast %32 : vector<1x128x128xbf16> to vector<128x128xbf16>
    %cst_26 = arith.constant dense<0.000000e+00> : vector<128x128xf32>
    %34 = tpu.matmul %31, %33, %cst_26 {dimension_numbers = #tpu.dot_dimension_numbers<[1], [0], [0], [1], [0, 0, 1, 1], [], []>} : vector<128x128xbf16>, vector<128x128xbf16>, vector<128x128xf32> -> vector<128x128xf32>
    %35 = vector.broadcast %4 : vector<1x128xf32> to vector<128x128xf32>
    %36 = arith.addf %34, %35 : vector<128x128xf32>
    %37 = vector.shape_cast %36 : vector<128x128xf32> to vector<2x64x128xf32>
    %38 = vector.shape_cast %30 : vector<2x128xf32> to vector<2x1x128xf32>
    %39 = vector.broadcast %38 : vector<2x1x128xf32> to vector<2x64x128xf32>
    %40 = arith.addf %37, %39 : vector<2x64x128xf32>
    %cst_27 = arith.constant 0.000000e+00 : f32
    %41 = vector.broadcast %cst_27 : f32 to vector<2x64x128xf32>
    %42 = arith.maximumf %40, %41 : vector<2x64x128xf32>
    %43 = vector.shape_cast %42 : vector<2x64x128xf32> to vector<128x128xf32>
    %44 = arith.truncf %43 : vector<128x128xf32> to vector<128x128xbf16>
    %c0_28 = arith.constant 0 : index
    %c0_29 = arith.constant 0 : index
    %45 = vector.load %arg4[%c0_28, %c0_29] : memref<128x16xbf16, #tpu.memory_space<vmem>>, vector<128x16xbf16>
    %cst_30 = arith.constant dense<0.000000e+00> : vector<128x16xf32>
    %46 = tpu.matmul %44, %45, %cst_30 {dimension_numbers = #tpu.dot_dimension_numbers<[1], [0], [0], [1], [0, 0, 1, 1], [], []>} : vector<128x128xbf16>, vector<128x16xbf16>, vector<128x16xf32> -> vector<128x16xf32>
    %c0_31 = arith.constant 0 : index
    %c0_32 = arith.constant 0 : index
    %47 = vector.load %arg6[%c0_31, %c0_32] : memref<1x16xf32, #tpu.memory_space<vmem>>, vector<1x16xf32>
    %48 = vector.broadcast %47 : vector<1x16xf32> to vector<128x16xf32>
    %49 = arith.addf %46, %48 : vector<128x16xf32>
    %50 = vector.shape_cast %49 : vector<128x16xf32> to vector<2x64x16xf32>
    %c0_33 = arith.constant 0 : index
    %c0_34 = arith.constant 0 : index
    %c0_35 = arith.constant 0 : index
    %51 = vector.load %arg7[%c0_33, %c0_34, %c0_35] : memref<2x64x16xf32, #tpu.memory_space<vmem>>, vector<2x64x16xf32>
    tpu.vector_store %arg7[%c0_33, %c0_34, %c0_35], %50 {strides = array<i32>} : memref<2x64x16xf32, #tpu.memory_space<vmem>>, vector<2x64x16xf32>,
    return
  }
  func.func @transform_0(%arg0: i32) -> (i32, i32, i32) {
    %c0_i32 = arith.constant 0 : i32
    %c0_i32_0 = arith.constant 0 : i32
    %c0_i32_1 = arith.constant 0 : i32
    return %arg0, %c0_i32, %c0_i32_0 : i32, i32, i32
  }
  func.func @transform_1(%arg0: i32) -> (i32, i32) {
    %c0_i32 = arith.constant 0 : i32
    %c0_i32_0 = arith.constant 0 : i32
    %c0_i32_1 = arith.constant 0 : i32
    return %c0_i32, %c0_i32_0 : i32, i32
  }
  func.func @transform_2(%arg0: i32) -> (i32, i32, i32) {
    %c0_i32 = arith.constant 0 : i32
    %c0_i32_0 = arith.constant 0 : i32
    %c0_i32_1 = arith.constant 0 : i32
    %c0_i32_2 = arith.constant 0 : i32
    return %c0_i32, %c0_i32_0, %c0_i32_1 : i32, i32, i32
  }
  func.func @transform_3(%arg0: i32) -> (i32, i32) {
    %c0_i32 = arith.constant 0 : i32
    %c0_i32_0 = arith.constant 0 : i32
    %c0_i32_1 = arith.constant 0 : i32
    return %c0_i32, %c0_i32_0 : i32, i32
  }
  func.func @transform_4(%arg0: i32) -> (i32, i32) {
    %c0_i32 = arith.constant 0 : i32
    %c0_i32_0 = arith.constant 0 : i32
    %c0_i32_1 = arith.constant 0 : i32
    return %c0_i32, %c0_i32_0 : i32, i32
  }
  func.func @transform_5(%arg0: i32) -> (i32, i32) {
    %c0_i32 = arith.constant 0 : i32
    %c0_i32_0 = arith.constant 0 : i32
    %c0_i32_1 = arith.constant 0 : i32
    return %c0_i32, %c0_i32_0 : i32, i32
  }
  func.func @transform_6(%arg0: i32) -> (i32, i32, i32) {
    %c0_i32 = arith.constant 0 : i32
    %c0_i32_0 = arith.constant 0 : i32
    %c0_i32_1 = arith.constant 0 : i32
    return %arg0, %c0_i32, %c0_i32_0 : i32, i32, i32
  }
}

module attributes {stable_mosaic.version = 11 : i64} {
  func.func @mlpg_kernel(%arg0: i32, %arg1: memref<2x64x16xbf16, #tpu.memory_space<vmem>>, %arg2: memref<16x128xbf16, #tpu.memory_space<vmem>>, %arg3: memref<4x128x128xbf16, #tpu.memory_space<vmem>>, %arg4: memref<128x16xbf16, #tpu.memory_space<vmem>>, %arg5: memref<3x128xf32, #tpu.memory_space<vmem>>, %arg6: memref<1x16xf32, #tpu.memory_space<vmem>>, %arg7: memref<2x64x16xf32, #tpu.memory_space<vmem>>) attributes {dimension_semantics = [#tpu.dimension_semantics<parallel>], iteration_bounds = array<i64: 2>, scalar_prefetch = 0 : i64, scratch_operands = 0 : i64, tpu.core_type = #tpu.core_type<tc>, window_params = [{transform_indices = @transform_0, window_bounds = array<i64: 2, 64, 16>}, {pipeline_mode = #tpu.pipeline_mode<synchronous>, transform_indices = @transform_1, window_bounds = array<i64: 16, 128>}, {pipeline_mode = #tpu.pipeline_mode<synchronous>, transform_indices = @transform_2, window_bounds = array<i64: 4, 128, 128>}, {pipeline_mode = #tpu.pipeline_mode<synchronous>, transform_indices = @transform_3, window_bounds = array<i64: 128, 16>}, {pipeline_mode = #tpu.pipeline_mode<synchronous>, transform_indices = @transform_4, window_bounds = array<i64: 3, 128>}, {pipeline_mode = #tpu.pipeline_mode<synchronous>, transform_indices = @transform_5, window_bounds = array<i64: 1, 16>}, {transform_indices = @transform_6, window_bounds = array<i64: 2, 64, 16>}]} {
    %c0 = arith.constant 0 : index
    %c0_0 = arith.constant 0 : index
    %c0_1 = arith.constant 0 : index
    %0 = vector.load %arg1[%c0, %c0_0, %c0_1] : memref<2x64x16xbf16, #tpu.memory_space<vmem>>, vector<2x64x16xbf16>
    %1 = vector.shape_cast %0 : vector<2x64x16xbf16> to vector<128x16xbf16>
    %c0_2 = arith.constant 0 : index
    %c0_3 = arith.constant 0 : index
    %2 = vector.load %arg5[%c0_2, %c0_3] : memref<3x128xf32, #tpu.memory_space<vmem>>, vector<1x128xf32>
    %c1 = arith.constant 1 : index
    %c0_4 = arith.constant 0 : index
    %3 = vector.load %arg5[%c1, %c0_4] : memref<3x128xf32, #tpu.memory_space<vmem>>, vector<1x128xf32>
    %c2 = arith.constant 2 : index
    %c0_5 = arith.constant 0 : index
    %4 = vector.load %arg5[%c2, %c0_5] : memref<3x128xf32, #tpu.memory_space<vmem>>, vector<1x128xf32>
    %c0_6 = arith.constant 0 : index
    %c0_7 = arith.constant 0 : index
    %5 = vector.load %arg2[%c0_6, %c0_7] : memref<16x128xbf16, #tpu.memory_space<vmem>>, vector<16x128xbf16>
    %cst = arith.constant dense<0.000000e+00> : vector<128x128xf32>
    %6 = tpu.matmul %1, %5, %cst {dimension_numbers = #tpu.dot_dimension_numbers<[1], [0], [0], [1], [0, 0, 1, 1], [], []>} : vector<128x16xbf16>, vector<16x128xbf16>, vector<128x128xf32> -> vector<128x128xf32>
    %cst_8 = arith.constant 0.000000e+00 : f32
    %7 = vector.broadcast %cst_8 : f32 to vector<128x128xf32>
    %8 = arith.maximumf %6, %7 : vector<128x128xf32>
    %9 = arith.truncf %8 : vector<128x128xf32> to vector<128x128xbf16>
    %c0_9 = arith.constant 0 : index
    %c0_10 = arith.constant 0 : index
    %c0_11 = arith.constant 0 : index
    %10 = vector.load %arg3[%c0_9, %c0_10, %c0_11] : memref<4x128x128xbf16, #tpu.memory_space<vmem>>, vector<1x128x128xbf16>
    %11 = vector.shape_cast %10 : vector<1x128x128xbf16> to vector<128x128xbf16>
    %cst_12 = arith.constant dense<0.000000e+00> : vector<128x128xf32>
    %12 = tpu.matmul %9, %11, %cst_12 {dimension_numbers = #tpu.dot_dimension_numbers<[1], [0], [0], [1], [0, 0, 1, 1], [], []>} : vector<128x128xbf16>, vector<128x128xbf16>, vector<128x128xf32> -> vector<128x128xf32>
    %13 = vector.broadcast %2 : vector<1x128xf32> to vector<128x128xf32>
    %14 = arith.addf %12, %13 : vector<128x128xf32>
    %cst_13 = arith.constant 0.000000e+00 : f32
    %15 = vector.broadcast %cst_13 : f32 to vector<128x128xf32>
    %16 = arith.maximumf %14, %15 : vector<128x128xf32>
    %17 = arith.truncf %16 : vector<128x128xf32> to vector<128x128xbf16>
    %c1_14 = arith.constant 1 : index
    %c0_15 = arith.constant 0 : index
    %c0_16 = arith.constant 0 : index
    %18 = vector.load %arg3[%c1_14, %c0_15, %c0_16] : memref<4x128x128xbf16, #tpu.memory_space<vmem>>, vector<1x128x128xbf16>
    %19 = vector.shape_cast %18 : vector<1x128x128xbf16> to vector<128x128xbf16>
    %cst_17 = arith.constant dense<0.000000e+00> : vector<128x128xf32>
    %20 = tpu.matmul %17, %19, %cst_17 {dimension_numbers = #tpu.dot_dimension_numbers<[1], [0], [0], [1], [0, 0, 1, 1], [], []>} : vector<128x128xbf16>, vector<128x128xbf16>, vector<128x128xf32> -> vector<128x128xf32>
    %21 = vector.broadcast %3 : vector<1x128xf32> to vector<128x128xf32>
    %22 = arith.addf %20, %21 : vector<128x128xf32>
    %cst_18 = arith.constant 0.000000e+00 : f32
    %23 = vector.broadcast %cst_18 : f32 to vector<128x128xf32>
    %24 = arith.maximumf %22, %23 : vector<128x128xf32>
    %25 = vector.shape_cast %24 : vector<128x128xf32> to vector<2x64x128xf32>
    %cst_19 = arith.constant dense<0xFF800000> : vector<2x128xf32>
    %26 = vector.multi_reduction <maximumf>, %25, %cst_19 [1] : vector<2x64x128xf32> to vector<2x128xf32>
    %27 = arith.truncf %26 : vector<2x128xf32> to vector<2x128xbf16>
    %c3 = arith.constant 3 : index
    %c0_20 = arith.constant 0 : index
    %c0_21 = arith.constant 0 : index
    %28 = vector.load %arg3[%c3, %c0_20, %c0_21] : memref<4x128x128xbf16, #tpu.memory_space<vmem>>, vector<1x128x128xbf16>
    %29 = vector.shape_cast %28 : vector<1x128x128xbf16> to vector<128x128xbf16>
    %cst_22 = arith.constant dense<0.000000e+00> : vector<2x128xf32>
    %30 = tpu.matmul %27, %29, %cst_22 {dimension_numbers = #tpu.dot_dimension_numbers<[1], [0], [0], [1], [0, 0, 1, 1], [], []>} : vector<2x128xbf16>, vector<128x128xbf16>, vector<2x128xf32> -> vector<2x128xf32>
    %31 = arith.truncf %24 : vector<128x128xf32> to vector<128x128xbf16>
    %c2_23 = arith.constant 2 : index
    %c0_24 = arith.constant 0 : index
    %c0_25 = arith.constant 0 : index
    %32 = vector.load %arg3[%c2_23, %c0_24, %c0_25] : memref<4x128x128xbf16, #tpu.memory_space<vmem>>, vector<1x128x128xbf16>
    %33 = vector.shape_cast %32 : vector<1x128x128xbf16> to vector<128x128xbf16>
    %cst_26 = arith.constant dense<0.000000e+00> : vector<128x128xf32>
    %34 = tpu.matmul %31, %33, %cst_26 {dimension_numbers = #tpu.dot_dimension_numbers<[1], [0], [0], [1], [0, 0, 1, 1], [], []>} : vector<128x128xbf16>, vector<128x128xbf16>, vector<128x128xf32> -> vector<128x128xf32>
    %35 = vector.broadcast %4 : vector<1x128xf32> to vector<128x128xf32>
    %36 = arith.addf %34, %35 : vector<128x128xf32>
    %37 = vector.shape_cast %36 : vector<128x128xf32> to vector<2x64x128xf32>
    %38 = vector.shape_cast %30 : vector<2x128xf32> to vector<2x1x128xf32>
    %39 = vector.broadcast %38 : vector<2x1x128xf32> to vector<2x64x128xf32>
    %40 = arith.addf %37, %39 : vector<2x64x128xf32>
    %cst_27 = arith.constant 0.000000e+00 : f32
    %41 = vector.broadcast %cst_27 : f32 to vector<2x64x128xf32>
    %42 = arith.maximumf %40, %41 : vector<2x64x128xf32>
    %43 = vector.shape_cast %42 : vector<2x64x128xf32> to vector<128x128xf32>
    %44 = arith.truncf %43 : vector<128x128xf32> to vector<128x128xbf16>
    %c0_28 = arith.constant 0 : index
    %c0_29 = arith.constant 0 : index
    %45 = vector.load %arg4[%c0_28, %c0_29] : memref<128x16xbf16, #tpu.memory_space<vmem>>, vector<128x16xbf16>
    %cst_30 = arith.constant dense<0.000000e+00> : vector<128x16xf32>
    %46 = tpu.matmul %44, %45, %cst_30 {dimension_numbers = #tpu.dot_dimension_numbers<[1], [0], [0], [1], [0, 0, 1, 1], [], []>} : vector<128x128xbf16>, vector<128x16xbf16>, vector<128x16xf32> -> vector<128x16xf32>
    %c0_31 = arith.constant 0 : index
    %c0_32 = arith.constant 0 : index
    %47 = vector.load %arg6[%c0_31, %c0_32] : memref<1x16xf32, #tpu.memory_space<vmem>>, vector<1x16xf32>
    %48 = vector.broadcast %47 : vector<1x16xf32> to vector<128x16xf32>
    %49 = arith.addf %46, %48 : vector<128x16xf32>
    %50 = vector.shape_cast %49 : vector<128x16xf32> to vector<2x64x16xf32>
    %c0_33 = arith.constant 0 : index
    %c0_34 = arith.constant 0 : index
    %c0_35 = arith.constant 0 : index
    %51 = vector.load %arg7[%c0_33, %c0_34, %c0_35] : memref<2x64x16xf32, #tpu.memory_space<vmem>>, vector<2x64x16xf32>
    tpu.vector_store %arg7[%c0_33, %c0_34, %c0_35], %50 {strides = array<i32>} : memref<2x64x16xf32, #tpu.memory_space<vmem>>, vector<2x64x16xf32>,
    return
  }
  func.func @transform_0(%arg0: i32) -> (i32, i32, i32) {
    %c0_i32 = arith.constant 0 : i32
    %c0_i32_0 = arith.constant 0 : i32
    %c0_i32_1 = arith.constant 0 : i32
    return %arg0, %c0_i32, %c0_i32_0 : i32, i32, i32
  }
  func.func @transform_1(%arg0: i32) -> (i32, i32) {
    %c0_i32 = arith.constant 0 : i32
    %c0_i32_0 = arith.constant 0 : i32
    %c0_i32_1 = arith.constant 0 : i32
    return %c0_i32, %c0_i32_0 : i32, i32
  }
  func.func @transform_2(%arg0: i32) -> (i32, i32, i32) {
    %c0_i32 = arith.constant 0 : i32
    %c0_i32_0 = arith.constant 0 : i32
    %c0_i32_1 = arith.constant 0 : i32
    %c0_i32_2 = arith.constant 0 : i32
    return %c0_i32, %c0_i32_0, %c0_i32_1 : i32, i32, i32
  }
  func.func @transform_3(%arg0: i32) -> (i32, i32) {
    %c0_i32 = arith.constant 0 : i32
    %c0_i32_0 = arith.constant 0 : i32
    %c0_i32_1 = arith.constant 0 : i32
    return %c0_i32, %c0_i32_0 : i32, i32
  }
  func.func @transform_4(%arg0: i32) -> (i32, i32) {
    %c0_i32 = arith.constant 0 : i32
    %c0_i32_0 = arith.constant 0 : i32
    %c0_i32_1 = arith.constant 0 : i32
    return %c0_i32, %c0_i32_0 : i32, i32
  }
  func.func @transform_5(%arg0: i32) -> (i32, i32) {
    %c0_i32 = arith.constant 0 : i32
    %c0_i32_0 = arith.constant 0 : i32
    %c0_i32_1 = arith.constant 0 : i32
    return %c0_i32, %c0_i32_0 : i32, i32
  }
  func.func @transform_6(%arg0: i32) -> (i32, i32, i32) {
    %c0_i32 = arith.constant 0 : i32
    %c0_i32_0 = arith.constant 0 : i32
    %c0_i32_1 = arith.constant 0 : i32
    return %arg0, %c0_i32, %c0_i32_0 : i32, i32, i32
  }
}

</mosaic_0001>

<bundles_post_ra>
// kernel: tpu_custom_call.1
= control target key start
LH: loop header
LB: loop body
LE: loop exit
PB: predicated region body
PF: predicated region fallthrough
CT: control target
= control target key end

     0   :  { %11 = vsyncpa [#allocation3], 0  ;;  %s1998_s21 = smov 0   ;;  %s2188_s0 = inlined_call_operand.vmem [shape: bf16[4,64,16], index: 0, kind: input, shape index: {}]   ;;  %s2189_s1 = inlined_call_operand.vmem [shape: bf16[16,128], index: 1, kind: input, shape index: {}]   ;;  %s2190_s2 = inlined_call_operand.hbm [shape: bf16[4,128,128], index: 2, kind: input, shape index: {}]   ;;  %s2191_s3 = inlined_call_operand.vmem [shape: bf16[128,16], index: 3, kind: input, shape index: {}]   ;;  %s2192_s4 = inlined_call_operand.vmem [shape: f32[3,128], index: 4, kind: input, shape index: {}]   ;;  %s2193_s5 = inlined_call_operand.vmem [shape: f32[1,16], index: 5, kind: input, shape index: {}]   ;;  %s2194_s6 = inlined_call_operand.vmem [shape: f32[4,64,16], index: 6, kind: output, shape index: {}]  }
   0x1 LB: > { %s1502_s22 = sadd.s32 4294967295, %s1955_s21   ;;  %p1504_p0 = scmp.ge.s32.totalorder %s1955_s21, 1  ;;  %s1955_s21 = sphi %s1998_s21, %s17_s21  }
   0x2   : > { %p179_p1 = scmp.lt.s32.totalorder %s1955_s21, 3  ;;  %s1957_s23 = smov [#allocation2]  }
   0x3   : > { %s194_s24 = sshll.u32 %s1957_s23, 4  ;;  %p2012_p3 = scmp.eq.s32.totalorder %s1502_s22, 0  ;;  %s195_s24 = int_to_ptr.vmem [resolvable:$true] %s194_s24 }
   0x4   : > { %p2006_p2 = pnand %p1504_p0, %p179_p1  ;;  %s1917_s30 = scalar_lea.hbm %s2190_s2, 4096 }
   0x5   : > { %s2199_s26 = scalar_select %p2012_p3, 1, 0 }
   0x6   : > { %s2198_s25 = scalar_select %p2006_p2, 1, 0 }
   0x7   : > { %p1848_p4 = pneg %p2006_p2  ;;  %p1918_p6 = scmp.ne.s32.totalorder %s2190_s2, %s1917_s30 }
   0x8   : > { %p1924_p10 = scmp.lt.u32.totalorder %s1917_s30, %s2190_s2 }
   0x9   : > { %p2020_p5 = pnand %p2012_p3, %p1848_p4 }
   0xb   : > { %p1919_p7 = pneg %p2020_p5 }
   0xd   : > { %p1920_p8 = pnand %p1919_p7, %p1918_p6 }
   0xf   : > { %p1921_p9 = pneg %p1920_p8 }
  0x11   : > { %p1926_p11 = pnand %p1924_p10, %p1921_p9 }
  0x13   : > { %1929 = shalt.err (!%p1926_p11)
}
  0x14   : > { %s1930_s11 = scalar_lea.vmem %s195_s24, 4096  ;;  %p1938_p1 = scmp.lt.s32.totalorder %s195_s24, %s195_s24 }
  0x15   : > { %p1931_p12 = scmp.ne.s32.totalorder %s195_s24, %s1930_s11  ;;  %p1939_p4 = scmp.lt.s32.totalorder %s1930_s11, %s1930_s11 }
  0x17   : > { %p1933_p13 = pnand %p1931_p12, %p1919_p7  ;;  %p1940_p3 = por %p1939_p4, %p1938_p1 }
  0x19   : > { %p1934_p0 = pneg %p1933_p13 }
  0x1b   : > { %p1941_p2 = pnand %p1940_p3, %p1934_p0 }
  0x1d   : > { %1944 = shalt.err (!%p1941_p2)
}
  0x1e   : > { %s1958_s12 = smov 64   ;;  %s1959_s13 = smov 4  }
  0x1f   : > { %1851 = dma.hbm_to_vmem [thread:$0]  (!%p2020_p5), %s2190_s2, 4096, %s195_s24, [#allocation3], %s1958_s12, %s1958_s12, %s1959_s13  }
  0x20   : > { %p2201_p6 = scmp.ne.s32.totalorder %s2198_s25, 0 }
  0x21   : > { %p2202_p8 = scmp.ne.s32.totalorder (!%p2201_p6), %s2199_s26, 0 }
  0x22   : > { %229 = sbr.rel (%p2201_p6) target bundleno = 1220 (0x4c4), region = 44 }
  0x29   : > { %1950 = dma.done.wait (%p2202_p8), [#allocation3], 4096  }
  0x2a   : > { %1952 = vsyncadd (%p2202_p8), [#allocation3], 4294963200  ;;  %s1509_s16 = sshll.u32 %s1502_s22, 1  ;;  %v1868_v0 = vld [vmem:[%s2189_s1] sm:$0xff]   ;;  %vm343_vm0 = vcmask 130048   ;;  %v1878_v6 = vld [vmem:[#allocation2 + $0x8] sm:$0xff]  }
  0x2b   : > { %p262_p2 = scmp.lt.s32.totalorder %s1509_s16, 3  ;;  %1662 = vmatprep.subr.bf16.mxu0 %v1868_v0  ;;  %v1877_v5 = vld [vmem:[#allocation2] sm:$0xff]   ;;  %v1879_v8 = vld [vmem:[#allocation2 + $0x10] sm:$0xff]   ;;  %v1880_v9 = vld [vmem:[#allocation2 + $0x18] sm:$0xff]   ;;  %vm1961_vm1 = vmmov 0   ;;  %vm909_vm2 = vcmask 1041409  }
  0x2c   : > { %1663 = vmatpush3.bf16.msra.mxu0 %v1868_v0  ;;  %1680 = vmatprep.subr.bf16.mxu1 %v1877_v5  ;;  %v1881_v12 = vld [vmem:[#allocation2 + $0x20] sm:$0xff]   ;;  %v1882_v13 = vld [vmem:[#allocation2 + $0x28] sm:$0xff]   ;;  %v1883_v15 = vld [vmem:[#allocation2 + $0x30] sm:$0xff]  }
  0x2d   : > { %s2204_s16 = smov (!%p262_p2, %s1509_s16), 3  ;;  %1681 = vmatpush3.bf16.msra.mxu1 %v1877_v5  ;;  %v1884_v16 = vld [vmem:[#allocation2 + $0x38] sm:$0xff]   ;;  %v1885_v17 = vld [vmem:[#allocation2 + $0x40] sm:$0xff]   ;;  %v1886_v18 = vld [vmem:[#allocation2 + $0x48] sm:$0xff]  }
  0x2e   : > { %s1578_s17 = sshll.u32 %s2204_s16, 5  ;;  %1682 = vmatprep.subr.bf16.mxu1 %v1878_v6  ;;  %1712 = vmatprep.subr.bf16.mxu0 %v1885_v17  ;;  %v1887_v19 = vld [vmem:[#allocation2 + $0x50] sm:$0xff]   ;;  %v1888_v20 = vld [vmem:[#allocation2 + $0x58] sm:$0xff]   ;;  %v1889_v21 = vld [vmem:[#allocation2 + $0x60] sm:$0xff]   ;;  %s1579_s22 = sshll.u32 %s2204_s16, 6 }
  0x2f   : > { %s2054_s20 = scalar_lea.vmem %s2188_s0, %s1578_s17  ;;  %v1890_v22 = vld [vmem:[#allocation2 + $0x68] sm:$0xff]   ;;  %v1891_v63 = vld [vmem:[#allocation2 + $0x70] sm:$0xff]   ;;  %v1892_v0 = vld [vmem:[#allocation2 + $0x78] sm:$0xff]   ;;  %s2151_s29 = scalar_lea.vmem %s2194_s6, %s1579_s22 }
  0x30   : > { %v1869_v1 = vld [vmem:[%s2054_s20] sm:$0xff]   ;;  %v1870_v2 = vld [vmem:[%s2054_s20 + $0x8] sm:$0xff]   ;;  %v1871_v3 = vld [vmem:[%s2054_s20 + $0x10] sm:$0xff]  }
  0x31   : > { %1664 = vmatprep.mubr.msk.bf16.mxu0 %vm343_vm0, %v1869_v1  ;;  %v1872_v4 = vld [vmem:[%s2054_s20 + $0x18] sm:$0xff]   ;;  %v1873_v7 = vld [vmem:[%s2054_s20 + $0x20] sm:$0xff]   ;;  %v1874_v10 = vld [vmem:[%s2054_s20 + $0x28] sm:$0xff]   ;;  %1683 = vmatpush3.bf16.msra.mxu1 %v1878_v6 }
  0x32   : > { %1665 = vmatmul.mubr.msk.bf16.vlgmr.msra.gmra.mrb[0].mxu0 %vm343_vm0, %v1870_v2  ;;  %v1875_v11 = vld [vmem:[%s2054_s20 + $0x30] sm:$0xff]   ;;  %1684 = vmatprep.subr.bf16.mxu1 %v1879_v8  ;;  %v1876_v14 = vld [vmem:[%s2054_s20 + $0x38] sm:$0xff]   ;;  %v1893_v1 = vld [vmem:[#allocation2 + $0x80] sm:$0xff]  }
  0x33   : > { %1668 = vmatprep.mubr.msk.bf16.mxu0 %vm343_vm0, %v1871_v3  ;;  %1713 = vmatpush3.bf16.msra.mxu0 %v1885_v17  ;;  %v2078_v2 = vld [vmem:[%s2192_s4] ss:$0 sm:$0xff] }
  0x34   : > { %1714 = vmatprep.subr.bf16.mxu0 %v1886_v18 }
  0x35   : > { %1685 = vmatpush3.bf16.msra.mxu1 %v1879_v8 }
  0x36   : > { %1686 = vmatprep.subr.bf16.mxu1 %v1880_v9 }
  0x37   : > { %1715 = vmatpush3.bf16.msra.mxu0 %v1886_v18 }
  0x38   : > { %1716 = vmatprep.subr.bf16.mxu0 %v1887_v19 }
  0x39   : > { %1687 = vmatpush3.bf16.msra.mxu1 %v1880_v9 }
  0x3a   : > { %1669 = vmatmul.mubr.msk.bf16.gmra.mrb[4].mxu0 %vm343_vm0, %v1872_v4  ;;  %1688 = vmatprep.subr.bf16.mxu1 %v1881_v12 }
  0x3b   : > { %1672 = vmatprep.mubr.msk.bf16.mxu0 %vm343_vm0, %v1873_v7  ;;  %1717 = vmatpush3.bf16.msra.mxu0 %v1887_v19 }
  0x3c   : > { %1718 = vmatprep.subr.bf16.mxu0 %v1888_v20 }
  0x3d   : > { %1689 = vmatpush3.bf16.msra.mxu1 %v1881_v12 }
  0x3e   : > { %1690 = vmatprep.subr.bf16.mxu1 %v1882_v13 }
  0x3f   : > { %1719 = vmatpush3.bf16.msra.mxu0 %v1888_v20  ;;  %v1894_v20 = vld [vmem:[#allocation2 + $0x88] sm:$0xff]  }
  0x40   : > { %1720 = vmatprep.subr.bf16.mxu0 %v1889_v21 }
  0x41   : > { %1691 = vmatpush3.bf16.msra.mxu1 %v1882_v13 }
  0x42   : > { %1673 = vmatmul.mubr.msk.bf16.gmra.mrb[8].mxu0 %vm343_vm0, %v1874_v10  ;;  %1692 = vmatprep.subr.bf16.mxu1 %v1883_v15 }
  0x43   : > { %1676 = vmatprep.mubr.msk.bf16.mxu0 %vm343_vm0, %v1875_v11  ;;  %1721 = vmatpush3.bf16.msra.mxu0 %v1889_v21 }
  0x44   : > { %1722 = vmatprep.subr.bf16.mxu0 %v1890_v22 }
  0x45   : > { %1693 = vmatpush3.bf16.msra.mxu1 %v1883_v15 }
  0x46   : > { %1694 = vmatprep.subr.bf16.mxu1 %v1884_v16 }
  0x47   : > { %1723 = vmatpush3.bf16.msra.mxu0 %v1890_v22 }
  0x48   : > { %1724 = vmatprep.subr.bf16.mxu0 %v1891_v63 }
  0x49   : > { %1695 = vmatpush3.bf16.msra.mxu1 %v1884_v16 }
  0x4a   : > { %1677 = vmatmul.mubr.msk.bf16.gmra.mrb[12].mxu0 %vm343_vm0, %v1876_v14 }
  0x4b   : > { %1725 = vmatpush3.bf16.msra.mxu0 %v1891_v63 }
  0x4c   : > { %1726 = vmatprep.subr.bf16.mxu0 %v1892_v0 }
  0x4f   : > { %1727 = vmatpush3.bf16.msra.mxu0 %v1892_v0  ;;  %v1899_v0 = vld [vmem:[#allocation2 + $0xb0] sm:$0xff]  }
  0x50   : > { %1764 = vmatprep.subr.bf16.mxu0 %v1893_v1 }
 0x105   : > { %v1666_v23 = vpop.f32.mrb[0].mxu0 }
 0x106   : > { %v402_v24 = vpop.f32.mrb[1].mxu0  ;;  %v467_v26 = vmax.f32 %v1666_v23, 0.0 }
 0x107   : > { %v1667_v25 = vpop.f32.mrb[2].mxu0  ;;  %v465_v29 = vmax.f32 %v402_v24, 0.0 }
 0x108   : > { %v468_v27 = vmax.f32 %v1667_v25, 0.0  ;;  %v405_v28 = vpop.f32.mrb[3].mxu0 }
 0x109   : > { %v466_v30 = vmax.f32 %v405_v28, 0.0  ;;  %v1895_v28 = vld [vmem:[#allocation2 + $0x90] sm:$0xff]  }
 0x10a   : > { %v482_v31 = vpack.c.bf16 %v468_v27, %v467_v26 }
 0x10b   : > { %v481_v32 = vpack.c.bf16 %v466_v30, %v465_v29 }
 0x10d   : > { %v1670_v33 = vpop.f32.mrb[4].mxu0  ;;  %1696 = vmatprep.mubr.bf16.mxu1 %v481_v32 }
 0x10e   : > { %v418_v34 = vpop.f32.mrb[5].mxu0  ;;  %1697 = vmatmul.mubr.bf16.vlgmr.msra.gmra.mrb[0].mxu1 %v482_v31  ;;  %v471_v36 = vmax.f32 %v1670_v33, 0.0 }
 0x10f   : > { %v1671_v35 = vpop.f32.mrb[6].mxu0  ;;  %v469_v39 = vmax.f32 %v418_v34, 0.0 }
 0x110   : > { %v472_v37 = vmax.f32 %v1671_v35, 0.0  ;;  %v421_v38 = vpop.f32.mrb[7].mxu0 }
 0x111   : > { %v470_v40 = vmax.f32 %v421_v38, 0.0 }
 0x112   : > { %v484_v41 = vpack.c.bf16 %v472_v37, %v471_v36  ;;  %v1896_v36 = vld [vmem:[#allocation2 + $0x98] sm:$0xff]  }
 0x113   : > { %v483_v42 = vpack.c.bf16 %v470_v40, %v469_v39 }
 0x115   : > { %v1674_v43 = vpop.f32.mrb[8].mxu0  ;;  %1700 = vmatprep.mubr.bf16.mxu1 %v483_v42 }
 0x116   : > { %v434_v44 = vpop.f32.mrb[9].mxu0  ;;  %1701 = vmatmul.mubr.bf16.gmra.mrb[4].mxu1 %v484_v41  ;;  %v475_v46 = vmax.f32 %v1674_v43, 0.0 }
 0x117   : > { %v1675_v45 = vpop.f32.mrb[10].mxu0  ;;  %v473_v49 = vmax.f32 %v434_v44, 0.0  ;;  %v1897_v44 = vld [vmem:[#allocation2 + $0xa0] sm:$0xff]  }
 0x118   : > { %v476_v47 = vmax.f32 %v1675_v45, 0.0  ;;  %v437_v48 = vpop.f32.mrb[11].mxu0 }
 0x119   : > { %v474_v50 = vmax.f32 %v437_v48, 0.0 }
 0x11a   : > { %v486_v51 = vpack.c.bf16 %v476_v47, %v475_v46 }
 0x11b   : > { %v485_v52 = vpack.c.bf16 %v474_v50, %v473_v49 }
 0x11d   : > { %v1678_v53 = vpop.f32.mrb[12].mxu0  ;;  %1704 = vmatprep.mubr.bf16.mxu1 %v485_v52  ;;  %v1898_v52 = vld [vmem:[#allocation2 + $0xa8] sm:$0xff]  }
 0x11e   : > { %v450_v54 = vpop.f32.mrb[13].mxu0  ;;  %1705 = vmatmul.mubr.bf16.gmra.mrb[8].mxu1 %v486_v51  ;;  %v479_v56 = vmax.f32 %v1678_v53, 0.0 }
 0x11f   : > { %v1679_v55 = vpop.f32.mrb[14].mxu0  ;;  %v477_v59 = vmax.f32 %v450_v54, 0.0 }
 0x120   : > { %v480_v57 = vmax.f32 %v1679_v55, 0.0  ;;  %v453_v58 = vpop.f32.mrb[15].mxu0 }
 0x121   : > { %v478_v60 = vmax.f32 %v453_v58, 0.0 }
 0x122   : > { %v488_v61 = vpack.c.bf16 %v480_v57, %v479_v56 }
 0x123   : > { %v487_v62 = vpack.c.bf16 %v478_v60, %v477_v59 }
 0x125   : > { %1708 = vmatprep.mubr.bf16.mxu1 %v487_v62 }
 0x126   : > { %1709 = vmatmul.mubr.bf16.gmra.mrb[12].mxu1 %v488_v61 }
 0x1e1   : > { %v1698_v3 = vpop.f32.mrb[0].mxu1 }
 0x1e2   : > { %v600_v4 = vadd.f32 %v1698_v3, %v2078_v2  ;;  %v591_v5 = vpop.f32.mrb[1].mxu1  ;;  %v1901_v3 = vld [vmem:[#allocation2 + $0xc0] sm:$0xff]  }
 0x1e3   : > { %v592_v6 = vadd.f32 %v2078_v2, %v591_v5  ;;  %v1699_v7 = vpop.f32.mrb[2].mxu1  ;;  %v1903_v5 = vld [vmem:[#allocation2 + $0xd0] sm:$0xff]  }
 0x1e4   : > { %v603_v8 = vadd.f32 %v1699_v7, %v2078_v2  ;;  %v594_v9 = vpop.f32.mrb[3].mxu1  ;;  %v656_v11 = vmax.f32 %v600_v4, 0.0  ;;  %v1960_v4 = vmov 0.0   ;;  %v1905_v7 = vld [vmem:[#allocation2 + $0xe0] sm:$0xff]  }
 0x1e5   : > { %v595_v10 = vadd.f32 %v2078_v2, %v594_v9  ;;  %v654_v13 = vmax.f32 %v592_v6, 0.0  ;;  %1744 = vmatprep.subr.bf16.mxu1 %v1960_v4  ;;  %v1904_v6 = vld [vmem:[#allocation2 + $0xd8] sm:$0xff]   ;;  %v1907_v9 = vld [vmem:[#allocation2 + $0xf0] sm:$0xff]   ;;  %1760 = vmatprep.mubr.msk.bf16.mxu1 %vm1961_vm1, %v1960_v4 }
 0x1e6   : > { %v657_v12 = vmax.f32 %v603_v8, 0.0  ;;  %1745 = vmatpush3.bf16.msra.mxu1 %v1901_v3  ;;  %v1906_v8 = vld [vmem:[#allocation2 + $0xe8] sm:$0xff]  }
 0x1e7   : > { %v655_v14 = vmax.f32 %v595_v10, 0.0  ;;  %1746 = vmatprep.subr.bf16.mxu1 %v1960_v4  ;;  %v1908_v10 = vld [vmem:[#allocation2 + $0xf8] sm:$0xff]  }
 0x1e8   : > { %v671_v15 = vpack.c.bf16 %v657_v12, %v656_v11  ;;  %v2099_v11 = vld [vmem:[%s2192_s4 + $0x1] ss:$0 sm:$0xff] }
 0x1e9   : > { %v670_v16 = vpack.c.bf16 %v655_v14, %v654_v13  ;;  %v1702_v17 = vpop.f32.mrb[4].mxu1 }
 0x1ea   : > { %v616_v18 = vadd.f32 %v1702_v17, %v2078_v2  ;;  %v607_v19 = vpop.f32.mrb[5].mxu1 }
 0x1eb   : > { %v608_v21 = vadd.f32 %v2078_v2, %v607_v19  ;;  %v1703_v22 = vpop.f32.mrb[6].mxu1  ;;  %1728 = vmatprep.mubr.bf16.mxu0 %v670_v16 }
 0x1ec   : > { %v619_v23 = vadd.f32 %v1703_v22, %v2078_v2  ;;  %v610_v24 = vpop.f32.mrb[7].mxu1  ;;  %1729 = vmatmul.mubr.bf16.vlgmr.msra.gmra.mrb[16].mxu0 %v671_v15  ;;  %v660_v26 = vmax.f32 %v616_v18, 0.0 }
 0x1ed   : > { %v611_v25 = vadd.f32 %v2078_v2, %v610_v24  ;;  %1765 = vmatpush3.bf16.msra.mxu0 %v1893_v1  ;;  %v658_v29 = vmax.f32 %v608_v21, 0.0  ;;  %v1900_v1 = vld [vmem:[#allocation2 + $0xb8] sm:$0xff]  }
 0x1ee   : > { %v661_v27 = vmax.f32 %v619_v23, 0.0  ;;  %1766 = vmatprep.subr.bf16.mxu0 %v1894_v20 }
 0x1ef   : > { %v659_v30 = vmax.f32 %v611_v25, 0.0 }
 0x1f0   : > { %v673_v31 = vpack.c.bf16 %v661_v27, %v660_v26 }
 0x1f1   : > { %v672_v32 = vpack.c.bf16 %v659_v30, %v658_v29  ;;  %v1706_v33 = vpop.f32.mrb[8].mxu1  ;;  %1767 = vmatpush3.bf16.msra.mxu0 %v1894_v20 }
 0x1f2   : > { %v632_v34 = vadd.f32 %v1706_v33, %v2078_v2  ;;  %v623_v35 = vpop.f32.mrb[9].mxu1  ;;  %1768 = vmatprep.subr.bf16.mxu0 %v1895_v28 }
 0x1f3   : > { %v624_v37 = vadd.f32 %v2078_v2, %v623_v35  ;;  %v1707_v38 = vpop.f32.mrb[10].mxu1  ;;  %1732 = vmatprep.mubr.bf16.mxu0 %v672_v32 }
 0x1f4   : > { %v635_v39 = vadd.f32 %v1707_v38, %v2078_v2  ;;  %v626_v40 = vpop.f32.mrb[11].mxu1  ;;  %1733 = vmatmul.mubr.bf16.gmra.mrb[20].mxu0 %v673_v31  ;;  %v664_v42 = vmax.f32 %v632_v34, 0.0 }
 0x1f5   : > { %v627_v41 = vadd.f32 %v2078_v2, %v626_v40  ;;  %1769 = vmatpush3.bf16.msra.mxu0 %v1895_v28  ;;  %v662_v45 = vmax.f32 %v624_v37, 0.0 }
 0x1f6   : > { %v665_v43 = vmax.f32 %v635_v39, 0.0  ;;  %1770 = vmatprep.subr.bf16.mxu0 %v1896_v36 }
 0x1f7   : > { %v663_v46 = vmax.f32 %v627_v41, 0.0 }
 0x1f8   : > { %v675_v47 = vpack.c.bf16 %v665_v43, %v664_v42 }
 0x1f9   : > { %v674_v48 = vpack.c.bf16 %v663_v46, %v662_v45  ;;  %v1710_v49 = vpop.f32.mrb[12].mxu1  ;;  %1771 = vmatpush3.bf16.msra.mxu0 %v1896_v36 }
 0x1fa   : > { %v648_v50 = vadd.f32 %v1710_v49, %v2078_v2  ;;  %v639_v51 = vpop.f32.mrb[13].mxu1  ;;  %1772 = vmatprep.subr.bf16.mxu0 %v1897_v44 }
 0x1fb   : > { %v640_v53 = vadd.f32 %v2078_v2, %v639_v51  ;;  %v1711_v54 = vpop.f32.mrb[14].mxu1  ;;  %1736 = vmatprep.mubr.bf16.mxu0 %v674_v48 }
 0x1fc   : > { %v651_v55 = vadd.f32 %v1711_v54, %v2078_v2  ;;  %v642_v56 = vpop.f32.mrb[15].mxu1  ;;  %1737 = vmatmul.mubr.bf16.gmra.mrb[24].mxu0 %v675_v47  ;;  %v668_v58 = vmax.f32 %v648_v50, 0.0 }
 0x1fd   : > { %v643_v57 = vadd.f32 %v2078_v2, %v642_v56  ;;  %1773 = vmatpush3.bf16.msra.mxu0 %v1897_v44  ;;  %v666_v60 = vmax.f32 %v640_v53, 0.0  ;;  %v1902_v2 = vld [vmem:[#allocation2 + $0xc8] sm:$0xff]  }
 0x1fe   : > { %v669_v59 = vmax.f32 %v651_v55, 0.0  ;;  %1774 = vmatprep.subr.bf16.mxu0 %v1898_v52  ;;  %1747 = vmatpush3.bf16.msra.mxu1 %v1902_v2 }
 0x1ff   : > { %v667_v61 = vmax.f32 %v643_v57, 0.0  ;;  %1748 = vmatprep.subr.bf16.mxu1 %v1960_v4 }
 0x200   : > { %v677_v62 = vpack.c.bf16 %v669_v59, %v668_v58 }
 0x201   : > { %v676_v63 = vpack.c.bf16 %v667_v61, %v666_v60  ;;  %1775 = vmatpush3.bf16.msra.mxu0 %v1898_v52 }
 0x202   : > { %1776 = vmatprep.subr.bf16.mxu0 %v1899_v0  ;;  %1749 = vmatpush3.bf16.msra.mxu1 %v1903_v5 }
 0x203   : > { %1740 = vmatprep.mubr.bf16.mxu0 %v676_v63  ;;  %1750 = vmatprep.subr.bf16.mxu1 %v1960_v4 }
 0x204   : > { %1741 = vmatmul.mubr.bf16.gmra.mrb[28].mxu0 %v677_v62 }
 0x205   : > { %1777 = vmatpush3.bf16.msra.mxu0 %v1899_v0 }
 0x206   : > { %1778 = vmatprep.subr.bf16.mxu0 %v1900_v1  ;;  %1751 = vmatpush3.bf16.msra.mxu1 %v1904_v6 }
 0x207   : > { %1752 = vmatprep.subr.bf16.mxu1 %v1960_v4 }
 0x209   : > { %1779 = vmatpush3.bf16.msra.mxu0 %v1900_v1 }
 0x20a   : > { %1753 = vmatpush3.bf16.msra.mxu1 %v1905_v7 }
 0x20b   : > { %1754 = vmatprep.subr.bf16.mxu1 %v1960_v4 }
 0x20e   : > { %1755 = vmatpush3.bf16.msra.mxu1 %v1906_v8 }
 0x20f   : > { %1756 = vmatprep.subr.bf16.mxu1 %v1960_v4 }
 0x212   : > { %1757 = vmatpush3.bf16.msra.mxu1 %v1907_v9 }
 0x213   : > { %1758 = vmatprep.subr.bf16.mxu1 %v1960_v4 }
 0x216   : > { %1759 = vmatpush3.bf16.msra.mxu1 %v1908_v10 }
 0x2bf   : > { %v1730_v12 = vpop.f32.mrb[16].mxu0 }
 0x2c0   : > { %v790_v13 = vadd.f32 %v1730_v12, %v2099_v11  ;;  %v781_v14 = vpop.f32.mrb[17].mxu0 }
 0x2c1   : > { %v782_v15 = vadd.f32 %v2099_v11, %v781_v14  ;;  %v1731_v16 = vpop.f32.mrb[18].mxu0 }
 0x2c2   : > { %v846_v17 = vmax.f32 %v790_v13, 0.0  ;;  %v793_v18 = vadd.f32 %v1731_v16, %v2099_v11  ;;  %v784_v19 = vpop.f32.mrb[19].mxu0 }
 0x2c3   : > { %v844_v20 = vmax.f32 %v782_v15, 0.0  ;;  %v785_v21 = vadd.f32 %v2099_v11, %v784_v19 }
 0x2c4   : > { %v847_v22 = vmax.f32 %v793_v18, 0.0 }
 0x2c5   : > { %v860_v23 = vmax.f32 %v844_v20, %v846_v17  ;;  %v845_v24 = vmax.f32 %v785_v21, 0.0 }
 0x2c6   : > { %v1002_v25 = vpack.c.bf16 %v847_v22, %v846_v17 }
 0x2c7   : > { %v861_v26 = vmax.f32 %v845_v24, %v847_v22  ;;  %v1001_v27 = vpack.c.bf16 %v845_v24, %v844_v20  ;;  %v1734_v28 = vpop.f32.mrb[20].mxu0 }
 0x2c8   : > { %v806_v29 = vadd.f32 %v1734_v28, %v2099_v11  ;;  %v797_v30 = vpop.f32.mrb[21].mxu0 }
 0x2c9   : > { %v798_v31 = vadd.f32 %v2099_v11, %v797_v30  ;;  %v1735_v32 = vpop.f32.mrb[22].mxu0  ;;  %1780 = vmatprep.mubr.bf16.mxu0 %v1001_v27 }
 0x2ca   : > { %v809_v33 = vadd.f32 %v1735_v32, %v2099_v11  ;;  %v800_v34 = vpop.f32.mrb[23].mxu0  ;;  %1781 = vmatmul.mubr.bf16.vlgmr.msra.gmra.mrb[32].mxu0 %v1002_v25  ;;  %v850_v37 = vmax.f32 %v806_v29, 0.0 }
 0x2cb   : > { %v848_v35 = vmax.f32 %v798_v31, 0.0  ;;  %v801_v36 = vadd.f32 %v2099_v11, %v800_v34 }
 0x2cc   : > { %v851_v38 = vmax.f32 %v809_v33, 0.0 }
 0x2cd   : > { %v862_v39 = vmax.f32 %v860_v23, %v848_v35  ;;  %v849_v40 = vmax.f32 %v801_v36, 0.0  ;;  %v1909_v36 = vld [vmem:[%s2191_s3] sm:$0xff]  }
 0x2ce   : > { %v1004_v41 = vpack.c.bf16 %v851_v38, %v850_v37  ;;  %1796 = vmatprep.subr.bf16.mxu0 %v1909_v36  ;;  %1828 = vmatprep.subr.bf16.mxu1 %v1909_v36 }
 0x2cf   : > { %v864_v42 = vmax.f32 %v862_v39, %v850_v37  ;;  %v863_v43 = vmax.f32 %v861_v26, %v849_v40  ;;  %v1003_v44 = vpack.c.bf16 %v849_v40, %v848_v35  ;;  %v1738_v45 = vpop.f32.mrb[24].mxu0  ;;  %v1910_v37 = vld [vmem:[%s2191_s3 + $0x8] sm:$0xff]   ;;  %1797 = vmatpush3.bf16.msra.mxu0 %v1909_v36  ;;  %v1912_v39 = vld [vmem:[%s2191_s3 + $0x18] sm:$0xff]   ;;  %v1913_v40 = vld [vmem:[%s2191_s3 + $0x20] sm:$0xff]  }
 0x2d0   : > { %v822_v46 = vadd.f32 %v1738_v45, %v2099_v11  ;;  %v813_v47 = vpop.f32.mrb[25].mxu0  ;;  %1798 = vmatprep.subr.bf16.mxu0 %v1910_v37 }
 0x2d1   : > { %v865_v48 = vmax.f32 %v863_v43, %v851_v38  ;;  %v814_v49 = vadd.f32 %v2099_v11, %v813_v47  ;;  %v1739_v50 = vpop.f32.mrb[26].mxu0  ;;  %1784 = vmatprep.mubr.bf16.mxu0 %v1003_v44  ;;  %v1911_v38 = vld [vmem:[%s2191_s3 + $0x10] sm:$0xff]   ;;  %v1916_v43 = vld [vmem:[%s2191_s3 + $0x38] sm:$0xff]  }
 0x2d2   : > { %v854_v51 = vmax.f32 %v822_v46, 0.0  ;;  %v825_v52 = vadd.f32 %v1739_v50, %v2099_v11  ;;  %v816_v53 = vpop.f32.mrb[27].mxu0  ;;  %1785 = vmatmul.mubr.bf16.gmra.mrb[36].mxu0 %v1004_v41  ;;  %v1914_v41 = vld [vmem:[%s2191_s3 + $0x28] sm:$0xff]  }
 0x2d3   : > { %v866_v54 = vmax.f32 %v864_v42, %v865_v48  ;;  %v852_v55 = vmax.f32 %v814_v49, 0.0  ;;  %v817_v56 = vadd.f32 %v2099_v11, %v816_v53  ;;  %1799 = vmatpush3.bf16.msra.mxu0 %v1910_v37  ;;  %v1915_v42 = vld [vmem:[%s2191_s3 + $0x30] sm:$0xff]  }
 0x2d4   : > { %v855_v57 = vmax.f32 %v825_v52, 0.0  ;;  %1800 = vmatprep.subr.bf16.mxu0 %v1911_v38 }
 0x2d5   : > { %v873_v58 = vmax.f32 %v852_v55, %v854_v51  ;;  %v853_v59 = vmax.f32 %v817_v56, 0.0  ;;  %v867_v61 = vrot.slane %v866_v54, 4 }
 0x2d6   : > { %v1006_v60 = vpack.c.bf16 %v855_v57, %v854_v51 }
 0x2d7   : > { %v874_v62 = vmax.f32 %v853_v59, %v855_v57  ;;  %v1005_v63 = vpack.c.bf16 %v853_v59, %v852_v55  ;;  %v1742_v0 = vpop.f32.mrb[28].mxu0  ;;  %v868_v7 = vmax.f32 %v866_v54, %v867_v61  ;;  %1801 = vmatpush3.bf16.msra.mxu0 %v1911_v38 }
 0x2d8   : > { %v838_v1 = vadd.f32 %v1742_v0, %v2099_v11  ;;  %v829_v3 = vpop.f32.mrb[29].mxu0  ;;  %1802 = vmatprep.subr.bf16.mxu0 %v1912_v39 }
 0x2d9   : > { %v830_v4 = vadd.f32 %v2099_v11, %v829_v3  ;;  %v1743_v2 = vpop.f32.mrb[30].mxu0  ;;  %1788 = vmatprep.mubr.bf16.mxu0 %v1005_v63  ;;  %v869_v16 = vrot.slane %v868_v7, 2  ;;  %v1558_v3 = vld [vmem:[%s2192_s4 + $0x2] ss:$0 sm:$0xff] }
 0x2da   : > { %v841_v5 = vadd.f32 %v1743_v2, %v2099_v11  ;;  %v832_v6 = vpop.f32.mrb[31].mxu0  ;;  %1789 = vmatmul.mubr.bf16.gmra.mrb[40].mxu0 %v1006_v60  ;;  %v858_v10 = vmax.f32 %v838_v1, 0.0  ;;  %v1962_v60 = vmov 1966171168  }
 0x2db   : > { %v856_v8 = vmax.f32 %v830_v4, 0.0  ;;  %v833_v9 = vadd.f32 %v2099_v11, %v832_v6  ;;  %v870_v21 = vmax.f32 %v868_v7, %v869_v16  ;;  %1803 = vmatpush3.bf16.msra.mxu0 %v1912_v39  ;;  %v1177_v61 = vunpack.c.l.s4 %v1962_v60 }
 0x2dc   : > { %v859_v12 = vmax.f32 %v841_v5, 0.0  ;;  %1804 = vmatprep.subr.bf16.mxu0 %v1913_v40 }
 0x2dd   : > { %v875_v13 = vmax.f32 %v873_v58, %v856_v8  ;;  %v857_v14 = vmax.f32 %v833_v9, 0.0  ;;  %v871_v24 = vrot.slane %v870_v21, 1  ;;  %v1178_v63 = vunpack.c.0.s8 %v1177_v61 }
 0x2de   : > { %v1008_v15 = vpack.c.bf16 %v859_v12, %v858_v10 }
 0x2df   : > { %v877_v17 = vmax.f32 %v875_v13, %v858_v10  ;;  %v876_v18 = vmax.f32 %v874_v62, %v857_v14  ;;  %v1007_v19 = vpack.c.bf16 %v857_v14, %v856_v8  ;;  %v872_v27 = vmax.f32 %v870_v21, %v871_v24  ;;  %1805 = vmatpush3.bf16.msra.mxu0 %v1913_v40 }
 0x2e0   : > { %1806 = vmatprep.subr.bf16.mxu0 %v1914_v41  ;;  %v1179_v62 = vlaneseq }
 0x2e1   : > { %v878_v20 = vmax.f32 %v876_v18, %v859_v12  ;;  %1792 = vmatprep.mubr.bf16.mxu0 %v1007_v19  ;;  %v886_v29 = vpack.c.bf16 %v872_v27, %v872_v27 }
 0x2e2   : > { %1793 = vmatmul.mubr.bf16.gmra.mrb[44].mxu0 %v1008_v15  ;;  %v1180_v0 = vshrl.u32 %v1179_v62, 7 }
 0x2e3   : > { %v879_v22 = vmax.f32 %v877_v17, %v878_v20  ;;  %v907_v32 = vunpack.c.l.b16 %v886_v29  ;;  %1807 = vmatpush3.bf16.msra.mxu0 %v1914_v41 }
 0x2e4   : > { %1808 = vmatprep.subr.bf16.mxu0 %v1915_v42  ;;  %v1181_v1 = vsub.s32 %v1178_v63, %v1180_v0  ;;  %v1200_v5 = vsub.s32 0, %v1180_v0 }
 0x2e5   : > { %v880_v23 = vrot.slane %v879_v22, 4 }
 0x2e7   : > { %v881_v25 = vmax.f32 %v879_v22, %v880_v23  ;;  %1809 = vmatpush3.bf16.msra.mxu0 %v1915_v42 }
 0x2e8   : > { %1810 = vmatprep.subr.bf16.mxu0 %v1916_v43 }
 0x2e9   : > { %v882_v26 = vrot.slane %v881_v25, 2 }
 0x2eb   : > { %v883_v11 = vmax.f32 %v881_v25, %v882_v26  ;;  %1811 = vmatpush3.bf16.msra.mxu0 %v1916_v43 }
 0x2ed   : > { %v884_v28 = vrot.slane %v883_v11, 1 }
 0x2ef   : > { %v885_v30 = vmax.f32 %v883_v11, %v884_v28 }
 0x2f1   : > { %v887_v31 = vpack.c.bf16 %v885_v30, %v885_v30 }
 0x2f3   : > { %v908_v33 = vunpack.c.l.b16 %v887_v31 }
 0x2f5   : > { %v910_v34 = vsel %vm909_vm2, %v908_v33, %v907_v32 }
 0x2f6   : > { %v911_v35 = vpack.c.b16 %v910_v34, %v910_v34 }
 0x2f8   : > { %1761 = vmatmul.mubr.bf16.vlgmr.msra.gmra.mrb[16].mxu1 %v911_v35 }
 0x2f9   : > { %1836 = vmatpush3.bf16.msra.mxu1 %v1909_v36 }
 0x2fa   : > { %1829 = vmatprep.subr.bf16.mxu1 %v1910_v37 }
 0x2fd   : > { %1837 = vmatpush3.bf16.msra.mxu1 %v1910_v37 }
 0x2fe   : > { %1830 = vmatprep.subr.bf16.mxu1 %v1911_v38 }
 0x301   : > { %1838 = vmatpush3.bf16.msra.mxu1 %v1911_v38 }
 0x302   : > { %1831 = vmatprep.subr.bf16.mxu1 %v1912_v39 }
 0x305   : > { %1839 = vmatpush3.bf16.msra.mxu1 %v1912_v39 }
 0x306   : > { %1832 = vmatprep.subr.bf16.mxu1 %v1913_v40 }
 0x309   : > { %1840 = vmatpush3.bf16.msra.mxu1 %v1913_v40 }
 0x30a   : > { %1833 = vmatprep.subr.bf16.mxu1 %v1914_v41 }
 0x30d   : > { %1841 = vmatpush3.bf16.msra.mxu1 %v1914_v41 }
 0x30e   : > { %1834 = vmatprep.subr.bf16.mxu1 %v1915_v42 }
 0x311   : > { %1842 = vmatpush3.bf16.msra.mxu1 %v1915_v42 }
 0x312   : > { %1835 = vmatprep.subr.bf16.mxu1 %v1916_v43 }
 0x315   : > { %1843 = vmatpush3.bf16.msra.mxu1 %v1916_v43 }
 0x39d   : > { %v1782_v44 = vpop.f32.mrb[32].mxu0 }
 0x39e   : > { %v1112_v45 = vpop.f32.mrb[33].mxu0  ;;  %v1121_v7 = vadd.f32 %v1782_v44, %v1558_v3 }
 0x39f   : > { %v1783_v46 = vpop.f32.mrb[34].mxu0  ;;  %v1113_v8 = vadd.f32 %v1558_v3, %v1112_v45 }
 0x3a0   : > { %v1115_v47 = vpop.f32.mrb[35].mxu0  ;;  %v1124_v9 = vadd.f32 %v1783_v46, %v1558_v3 }
 0x3a1   : > { %v1116_v10 = vadd.f32 %v1558_v3, %v1115_v47 }
 0x3a5   : > { %v1786_v48 = vpop.f32.mrb[36].mxu0 }
 0x3a6   : > { %v1128_v49 = vpop.f32.mrb[37].mxu0  ;;  %v1137_v13 = vadd.f32 %v1786_v48, %v1558_v3 }
 0x3a7   : > { %v1787_v50 = vpop.f32.mrb[38].mxu0  ;;  %v1129_v14 = vadd.f32 %v1558_v3, %v1128_v49 }
 0x3a8   : > { %v1131_v51 = vpop.f32.mrb[39].mxu0  ;;  %v1140_v18 = vadd.f32 %v1787_v50, %v1558_v3 }
 0x3a9   : > { %v1132_v19 = vadd.f32 %v1558_v3, %v1131_v51 }
 0x3ad   : > { %v1790_v52 = vpop.f32.mrb[40].mxu0 }
 0x3ae   : > { %v1144_v53 = vpop.f32.mrb[41].mxu0  ;;  %v1153_v20 = vadd.f32 %v1790_v52, %v1558_v3 }
 0x3af   : > { %v1791_v54 = vpop.f32.mrb[42].mxu0  ;;  %v1145_v21 = vadd.f32 %v1558_v3, %v1144_v53 }
 0x3b0   : > { %v1147_v55 = vpop.f32.mrb[43].mxu0  ;;  %v1156_v22 = vadd.f32 %v1791_v54, %v1558_v3 }
 0x3b1   : > { %v1148_v23 = vadd.f32 %v1558_v3, %v1147_v55 }
 0x3b5   : > { %v1794_v56 = vpop.f32.mrb[44].mxu0 }
 0x3b6   : > { %v1160_v57 = vpop.f32.mrb[45].mxu0  ;;  %v1169_v26 = vadd.f32 %v1794_v56, %v1558_v3 }
 0x3b7   : > { %v1795_v58 = vpop.f32.mrb[46].mxu0  ;;  %v1161_v27 = vadd.f32 %v1558_v3, %v1160_v57 }
 0x3b8   : > { %v1163_v59 = vpop.f32.mrb[47].mxu0  ;;  %v1172_v11 = vadd.f32 %v1795_v58, %v1558_v3 }
 0x3b9   : > { %v1164_v28 = vadd.f32 %v1558_v3, %v1163_v59 }
 0x3cb   : > { %v995_v4 = vpop.f32.mrb[16].mxu1 }
 0x3cc   : > { %v1182_v2 = vrot.slane %v995_v4, %v1181_v1  ;;  %v1762_v6 = vpop.f32.mrb[17].mxu1 }
 0x3cd   : > { %v998_v12 = vpop.f32.mrb[18].mxu1  ;;  %v1567_v6 = vld [vmem:[%s2193_s5] ss:$0 sm:$0xff] }
 0x3ce   : > { %v1183_v15 = vcombine.high %v1182_v2, %v1182_v2  ;;  %v1190_v16 = vrot.slane %v1182_v2, %v1181_v1  ;;  %v1763_v17 = vpop.f32.mrb[19].mxu1 }
 0x3d0   : > { %v1197_v24 = vrot.slane %v1183_v15, %v1181_v1  ;;  %v1201_v25 = vrot.slane %v1190_v16, %v1200_v5 }
 0x3d2   : > { %v1205_v29 = vrot.slane %v1197_v24, %v1200_v5  ;;  %v1208_v30 = vadd.f32 %v1201_v25, %v1113_v8  ;;  %v1209_v31 = vadd.f32 %v1201_v25, %v1116_v10  ;;  %v1212_v32 = vadd.f32 %v1201_v25, %v1129_v14 }
 0x3d3   : > { %v1213_v33 = vadd.f32 %v1201_v25, %v1132_v19  ;;  %v1210_v34 = vadd.f32 %v1201_v25, %v1121_v7  ;;  %v1211_v35 = vadd.f32 %v1201_v25, %v1124_v9  ;;  %v1214_v36 = vadd.f32 %v1201_v25, %v1137_v13 }
 0x3d4   : > { %v1224_v37 = vmax.f32 %v1208_v30, 0.0  ;;  %v1225_v38 = vmax.f32 %v1209_v31, 0.0  ;;  %v1228_v39 = vmax.f32 %v1212_v32, 0.0  ;;  %v1215_v40 = vadd.f32 %v1201_v25, %v1140_v18 }
 0x3d5   : > { %v1229_v41 = vmax.f32 %v1213_v33, 0.0  ;;  %v1226_v42 = vmax.f32 %v1210_v34, 0.0  ;;  %v1227_v43 = vmax.f32 %v1211_v35, 0.0  ;;  %v1230_v44 = vmax.f32 %v1214_v36, 0.0 }
 0x3d6   : > { %v1240_v45 = vpack.c.bf16 %v1225_v38, %v1224_v37  ;;  %v1231_v46 = vmax.f32 %v1215_v40, 0.0  ;;  %v1216_v47 = vadd.f32 %v1205_v29, %v1145_v21  ;;  %v1217_v48 = vadd.f32 %v1205_v29, %v1148_v23 }
 0x3d7   : > { %v1242_v49 = vpack.c.bf16 %v1229_v41, %v1228_v39  ;;  %v1241_v50 = vpack.c.bf16 %v1227_v43, %v1226_v42  ;;  %v1218_v51 = vadd.f32 %v1205_v29, %v1153_v20  ;;  %v1219_v52 = vadd.f32 %v1205_v29, %v1156_v22 }
 0x3d8   : > { %1812 = vmatprep.mubr.bf16.mxu0 %v1240_v45  ;;  %v1243_v53 = vpack.c.bf16 %v1231_v46, %v1230_v44  ;;  %v1232_v54 = vmax.f32 %v1216_v47, 0.0  ;;  %v1233_v55 = vmax.f32 %v1217_v48, 0.0  ;;  %v1220_v56 = vadd.f32 %v1205_v29, %v1161_v27 }
 0x3d9   : > { %1816 = vmatprep.mubr.bf16.mxu1 %v1242_v49  ;;  %1813 = vmatmul.mubr.bf16.vlgmr.msra.gmra.mrb[48].mxu0 %v1241_v50  ;;  %v1234_v57 = vmax.f32 %v1218_v51, 0.0  ;;  %v1235_v58 = vmax.f32 %v1219_v52, 0.0  ;;  %v1221_v59 = vadd.f32 %v1205_v29, %v1164_v28  ;;  %v1222_v60 = vadd.f32 %v1205_v29, %v1169_v26 }
 0x3da   : > { %1817 = vmatmul.mubr.bf16.vlgmr.msra.gmra.mrb[20].mxu1 %v1243_v53  ;;  %v1244_v61 = vpack.c.bf16 %v1233_v55, %v1232_v54  ;;  %v1236_v62 = vmax.f32 %v1220_v56, 0.0  ;;  %v1223_v63 = vadd.f32 %v1205_v29, %v1172_v11 }
 0x3db   : > { %v1245_v0 = vpack.c.bf16 %v1235_v58, %v1234_v57  ;;  %v1237_v1 = vmax.f32 %v1221_v59, 0.0  ;;  %v1238_v3 = vmax.f32 %v1222_v60, 0.0 }
 0x3dc   : > { %1820 = vmatprep.mubr.bf16.mxu1 %v1244_v61  ;;  %v1239_v4 = vmax.f32 %v1223_v63, 0.0 }
 0x3dd   : > { %v1246_v2 = vpack.c.bf16 %v1237_v1, %v1236_v62 }
 0x3de   : > { %v1247_v5 = vpack.c.bf16 %v1239_v4, %v1238_v3 }
 0x3e2   : > { %1821 = vmatmul.mubr.bf16.gmra.mrb[24].mxu1 %v1245_v0 }
 0x3e3   : > { %1824 = vmatprep.mubr.bf16.mxu1 %v1246_v2 }
 0x3ea   : > { %1825 = vmatmul.mubr.bf16.gmra.mrb[28].mxu1 %v1247_v5 }
 0x4ac   : > { %v1814_v7 = vpop.f32.mrb[48].mxu0 }
 0x4ad   : > { %v1362_v8 = vadd.f32 %v1814_v7, %v1567_v6  ;;  %v1818_v9 = vpop.f32.mrb[20].mxu1  ;;  %v1353_v10 = vpop.f32.mrb[49].mxu0 }
 0x4ae   : > { %v1378_v12 = vadd.f32 %v1818_v9, %v1567_v6  ;;  %v1354_v13 = vadd.f32 %v1567_v6, %v1353_v10  ;;  %v1369_v14 = vpop.f32.mrb[21].mxu1  ;;  %v1815_v15 = vpop.f32.mrb[50].mxu0 }
 0x4af   : > { %1418 = vst.msk [vmem:[%s2151_s29 + $0x10] sm:$0xff] %vm343_vm0, %v1362_v8  ;;  %v1370_v16 = vadd.f32 %v1567_v6, %v1369_v14  ;;  %v1365_v17 = vadd.f32 %v1815_v15, %v1567_v6  ;;  %v1819_v18 = vpop.f32.mrb[22].mxu1  ;;  %v1356_v19 = vpop.f32.mrb[51].mxu0 }
 0x4b0   : > { %1422 = vst.msk [vmem:[%s2151_s29 + $0x30] sm:$0xff] %vm343_vm0, %v1378_v12  ;;  %1416 = vst.msk [vmem:[%s2151_s29] sm:$0xff] %vm343_vm0, %v1354_v13  ;;  %v1381_v20 = vadd.f32 %v1819_v18, %v1567_v6  ;;  %v1357_v21 = vadd.f32 %v1567_v6, %v1356_v19  ;;  %v1372_v22 = vpop.f32.mrb[23].mxu1 }
 0x4b1   : > { %1420 = vst.msk [vmem:[%s2151_s29 + $0x20] sm:$0xff] %vm343_vm0, %v1370_v16  ;;  %1419 = vst.msk [vmem:[%s2151_s29 + $0x18] sm:$0xff] %vm343_vm0, %v1365_v17  ;;  %v1373_v23 = vadd.f32 %v1567_v6, %v1372_v22 }
 0x4b2   : > { %1423 = vst.msk [vmem:[%s2151_s29 + $0x38] sm:$0xff] %vm343_vm0, %v1381_v20  ;;  %1417 = vst.msk [vmem:[%s2151_s29 + $0x8] sm:$0xff] %vm343_vm0, %v1357_v21 }
 0x4b3   : > { %1421 = vst.msk [vmem:[%s2151_s29 + $0x28] sm:$0xff] %vm343_vm0, %v1373_v23 }
 0x4b5   : > { %v1822_v24 = vpop.f32.mrb[24].mxu1 }
 0x4b6   : > { %v1394_v25 = vadd.f32 %v1822_v24, %v1567_v6  ;;  %v1385_v26 = vpop.f32.mrb[25].mxu1 }
 0x4b7   : > { %v1386_v27 = vadd.f32 %v1567_v6, %v1385_v26  ;;  %v1823_v11 = vpop.f32.mrb[26].mxu1 }
 0x4b8   : > { %1426 = vst.msk [vmem:[%s2151_s29 + $0x50] sm:$0xff] %vm343_vm0, %v1394_v25  ;;  %v1397_v28 = vadd.f32 %v1823_v11, %v1567_v6  ;;  %v1388_v29 = vpop.f32.mrb[27].mxu1 }
 0x4b9   : > { %1424 = vst.msk [vmem:[%s2151_s29 + $0x40] sm:$0xff] %vm343_vm0, %v1386_v27  ;;  %v1389_v30 = vadd.f32 %v1567_v6, %v1388_v29 }
 0x4ba   : > { %1427 = vst.msk [vmem:[%s2151_s29 + $0x58] sm:$0xff] %vm343_vm0, %v1397_v28 }
 0x4bb   : > { %1425 = vst.msk [vmem:[%s2151_s29 + $0x48] sm:$0xff] %vm343_vm0, %v1389_v30 }
 0x4bd   : > { %v1826_v31 = vpop.f32.mrb[28].mxu1 }
 0x4be   : > { %v1410_v32 = vadd.f32 %v1826_v31, %v1567_v6  ;;  %v1401_v33 = vpop.f32.mrb[29].mxu1 }
 0x4bf   : > { %v1402_v34 = vadd.f32 %v1567_v6, %v1401_v33  ;;  %v1827_v35 = vpop.f32.mrb[30].mxu1 }
 0x4c0   : > { %1430 = vst.msk [vmem:[%s2151_s29 + $0x70] sm:$0xff] %vm343_vm0, %v1410_v32  ;;  %v1413_v36 = vadd.f32 %v1827_v35, %v1567_v6  ;;  %v1404_v37 = vpop.f32.mrb[31].mxu1 }
 0x4c1   : > { %1428 = vst.msk [vmem:[%s2151_s29 + $0x60] sm:$0xff] %vm343_vm0, %v1402_v34  ;;  %v1405_v38 = vadd.f32 %v1567_v6, %v1404_v37 }
 0x4c2   : > { %1431 = vst.msk [vmem:[%s2151_s29 + $0x78] sm:$0xff] %vm343_vm0, %v1413_v36 }
 0x4c3   : > { %1429 = vst.msk [vmem:[%s2151_s29 + $0x68] sm:$0xff] %vm343_vm0, %v1405_v38 }
 0x4c4 PF: > { %s17_s21 = sadd.s32 1, %s1955_s21  }
 0x4c5   : > { %p14_p3 = scmp.ge.s32.totalorder %s17_s21, 4  }
 0x4c7   :  { %16 = sbr.rel (!%p14_p3) target bundleno = 1 (0x1), region = 82 }
 0x4ce   :  { %1456 = vsyncpa [#allocation3], 1 }
 0x4cf   :  { %1458 = vsyncpa [#allocation3 + $0x1], 1 }

// kernel: tpu_custom_call.1
= control target key start
LH: loop header
LB: loop body
LE: loop exit
PB: predicated region body
PF: predicated region fallthrough
CT: control target
= control target key end

     0   :  { %11 = vsyncpa [#allocation3], 0  ;;  %s1998_s21 = smov 0   ;;  %s2188_s0 = inlined_call_operand.vmem [shape: bf16[4,64,16], index: 0, kind: input, shape index: {}]   ;;  %s2189_s1 = inlined_call_operand.vmem [shape: bf16[16,128], index: 1, kind: input, shape index: {}]   ;;  %s2190_s2 = inlined_call_operand.hbm [shape: bf16[4,128,128], index: 2, kind: input, shape index: {}]   ;;  %s2191_s3 = inlined_call_operand.vmem [shape: bf16[128,16], index: 3, kind: input, shape index: {}]   ;;  %s2192_s4 = inlined_call_operand.vmem [shape: f32[3,128], index: 4, kind: input, shape index: {}]   ;;  %s2193_s5 = inlined_call_operand.vmem [shape: f32[1,16], index: 5, kind: input, shape index: {}]   ;;  %s2194_s6 = inlined_call_operand.vmem [shape: f32[4,64,16], index: 6, kind: output, shape index: {}]  }
   0x1 LB: > { %s1502_s22 = sadd.s32 4294967295, %s1955_s21   ;;  %p1504_p0 = scmp.ge.s32.totalorder %s1955_s21, 1  ;;  %s1955_s21 = sphi %s1998_s21, %s17_s21  }
   0x2   : > { %p179_p1 = scmp.lt.s32.totalorder %s1955_s21, 3  ;;  %s1957_s23 = smov [#allocation2]  }
   0x3   : > { %s194_s24 = sshll.u32 %s1957_s23, 4  ;;  %p2012_p3 = scmp.eq.s32.totalorder %s1502_s22, 0  ;;  %s195_s24 = int_to_ptr.vmem [resolvable:$true] %s194_s24 }
   0x4   : > { %p2006_p2 = pnand %p1504_p0, %p179_p1  ;;  %s1917_s30 = scalar_lea.hbm %s2190_s2, 4096 }
   0x5   : > { %s2199_s26 = scalar_select %p2012_p3, 1, 0 }
   0x6   : > { %s2198_s25 = scalar_select %p2006_p2, 1, 0 }
   0x7   : > { %p1848_p4 = pneg %p2006_p2  ;;  %p1918_p6 = scmp.ne.s32.totalorder %s2190_s2, %s1917_s30 }
   0x8   : > { %p1924_p10 = scmp.lt.u32.totalorder %s1917_s30, %s2190_s2 }
   0x9   : > { %p2020_p5 = pnand %p2012_p3, %p1848_p4 }
   0xb   : > { %p1919_p7 = pneg %p2020_p5 }
   0xd   : > { %p1920_p8 = pnand %p1919_p7, %p1918_p6 }
   0xf   : > { %p1921_p9 = pneg %p1920_p8 }
  0x11   : > { %p1926_p11 = pnand %p1924_p10, %p1921_p9 }
  0x13   : > { %1929 = shalt.err (!%p1926_p11)
}
  0x14   : > { %s1930_s11 = scalar_lea.vmem %s195_s24, 4096  ;;  %p1938_p1 = scmp.lt.s32.totalorder %s195_s24, %s195_s24 }
  0x15   : > { %p1931_p12 = scmp.ne.s32.totalorder %s195_s24, %s1930_s11  ;;  %p1939_p4 = scmp.lt.s32.totalorder %s1930_s11, %s1930_s11 }
  0x17   : > { %p1933_p13 = pnand %p1931_p12, %p1919_p7  ;;  %p1940_p3 = por %p1939_p4, %p1938_p1 }
  0x19   : > { %p1934_p0 = pneg %p1933_p13 }
  0x1b   : > { %p1941_p2 = pnand %p1940_p3, %p1934_p0 }
  0x1d   : > { %1944 = shalt.err (!%p1941_p2)
}
  0x1e   : > { %s1958_s12 = smov 64   ;;  %s1959_s13 = smov 4  }
  0x1f   : > { %1851 = dma.hbm_to_vmem [thread:$0]  (!%p2020_p5), %s2190_s2, 4096, %s195_s24, [#allocation3], %s1958_s12, %s1958_s12, %s1959_s13  }
  0x20   : > { %p2201_p6 = scmp.ne.s32.totalorder %s2198_s25, 0 }
  0x21   : > { %p2202_p8 = scmp.ne.s32.totalorder (!%p2201_p6), %s2199_s26, 0 }
  0x22   : > { %229 = sbr.rel (%p2201_p6) target bundleno = 1220 (0x4c4), region = 44 }
  0x29   : > { %1950 = dma.done.wait (%p2202_p8), [#allocation3], 4096  }
  0x2a   : > { %1952 = vsyncadd (%p2202_p8), [#allocation3], 4294963200  ;;  %s1509_s16 = sshll.u32 %s1502_s22, 1  ;;  %v1868_v0 = vld [vmem:[%s2189_s1] sm:$0xff]   ;;  %vm343_vm0 = vcmask 130048   ;;  %v1878_v6 = vld [vmem:[#allocation2 + $0x8] sm:$0xff]  }
  0x2b   : > { %p262_p2 = scmp.lt.s32.totalorder %s1509_s16, 3  ;;  %1662 = vmatprep.subr.bf16.mxu0 %v1868_v0  ;;  %v1877_v5 = vld [vmem:[#allocation2] sm:$0xff]   ;;  %v1879_v8 = vld [vmem:[#allocation2 + $0x10] sm:$0xff]   ;;  %v1880_v9 = vld [vmem:[#allocation2 + $0x18] sm:$0xff]   ;;  %vm1961_vm1 = vmmov 0   ;;  %vm909_vm2 = vcmask 1041409  }
  0x2c   : > { %1663 = vmatpush3.bf16.msra.mxu0 %v1868_v0  ;;  %1680 = vmatprep.subr.bf16.mxu1 %v1877_v5  ;;  %v1881_v12 = vld [vmem:[#allocation2 + $0x20] sm:$0xff]   ;;  %v1882_v13 = vld [vmem:[#allocation2 + $0x28] sm:$0xff]   ;;  %v1883_v15 = vld [vmem:[#allocation2 + $0x30] sm:$0xff]  }
  0x2d   : > { %s2204_s16 = smov (!%p262_p2, %s1509_s16), 3  ;;  %1681 = vmatpush3.bf16.msra.mxu1 %v1877_v5  ;;  %v1884_v16 = vld [vmem:[#allocation2 + $0x38] sm:$0xff]   ;;  %v1885_v17 = vld [vmem:[#allocation2 + $0x40] sm:$0xff]   ;;  %v1886_v18 = vld [vmem:[#allocation2 + $0x48] sm:$0xff]  }
  0x2e   : > { %s1578_s17 = sshll.u32 %s2204_s16, 5  ;;  %1682 = vmatprep.subr.bf16.mxu1 %v1878_v6  ;;  %1712 = vmatprep.subr.bf16.mxu0 %v1885_v17  ;;  %v1887_v19 = vld [vmem:[#allocation2 + $0x50] sm:$0xff]   ;;  %v1888_v20 = vld [vmem:[#allocation2 + $0x58] sm:$0xff]   ;;  %v1889_v21 = vld [vmem:[#allocation2 + $0x60] sm:$0xff]   ;;  %s1579_s22 = sshll.u32 %s2204_s16, 6 }
  0x2f   : > { %s2054_s20 = scalar_lea.vmem %s2188_s0, %s1578_s17  ;;  %v1890_v22 = vld [vmem:[#allocation2 + $0x68] sm:$0xff]   ;;  %v1891_v63 = vld [vmem:[#allocation2 + $0x70] sm:$0xff]   ;;  %v1892_v0 = vld [vmem:[#allocation2 + $0x78] sm:$0xff]   ;;  %s2151_s29 = scalar_lea.vmem %s2194_s6, %s1579_s22 }
  0x30   : > { %v1869_v1 = vld [vmem:[%s2054_s20] sm:$0xff]   ;;  %v1870_v2 = vld [vmem:[%s2054_s20 + $0x8] sm:$0xff]   ;;  %v1871_v3 = vld [vmem:[%s2054_s20 + $0x10] sm:$0xff]  }
  0x31   : > { %1664 = vmatprep.mubr.msk.bf16.mxu0 %vm343_vm0, %v1869_v1  ;;  %v1872_v4 = vld [vmem:[%s2054_s20 + $0x18] sm:$0xff]   ;;  %v1873_v7 = vld [vmem:[%s2054_s20 + $0x20] sm:$0xff]   ;;  %v1874_v10 = vld [vmem:[%s2054_s20 + $0x28] sm:$0xff]   ;;  %1683 = vmatpush3.bf16.msra.mxu1 %v1878_v6 }
  0x32   : > { %1665 = vmatmul.mubr.msk.bf16.vlgmr.msra.gmra.mrb[0].mxu0 %vm343_vm0, %v1870_v2  ;;  %v1875_v11 = vld [vmem:[%s2054_s20 + $0x30] sm:$0xff]   ;;  %1684 = vmatprep.subr.bf16.mxu1 %v1879_v8  ;;  %v1876_v14 = vld [vmem:[%s2054_s20 + $0x38] sm:$0xff]   ;;  %v1893_v1 = vld [vmem:[#allocation2 + $0x80] sm:$0xff]  }
  0x33   : > { %1668 = vmatprep.mubr.msk.bf16.mxu0 %vm343_vm0, %v1871_v3  ;;  %1713 = vmatpush3.bf16.msra.mxu0 %v1885_v17  ;;  %v2078_v2 = vld [vmem:[%s2192_s4] ss:$0 sm:$0xff] }
  0x34   : > { %1714 = vmatprep.subr.bf16.mxu0 %v1886_v18 }
  0x35   : > { %1685 = vmatpush3.bf16.msra.mxu1 %v1879_v8 }
  0x36   : > { %1686 = vmatprep.subr.bf16.mxu1 %v1880_v9 }
  0x37   : > { %1715 = vmatpush3.bf16.msra.mxu0 %v1886_v18 }
  0x38   : > { %1716 = vmatprep.subr.bf16.mxu0 %v1887_v19 }
  0x39   : > { %1687 = vmatpush3.bf16.msra.mxu1 %v1880_v9 }
  0x3a   : > { %1669 = vmatmul.mubr.msk.bf16.gmra.mrb[4].mxu0 %vm343_vm0, %v1872_v4  ;;  %1688 = vmatprep.subr.bf16.mxu1 %v1881_v12 }
  0x3b   : > { %1672 = vmatprep.mubr.msk.bf16.mxu0 %vm343_vm0, %v1873_v7  ;;  %1717 = vmatpush3.bf16.msra.mxu0 %v1887_v19 }
  0x3c   : > { %1718 = vmatprep.subr.bf16.mxu0 %v1888_v20 }
  0x3d   : > { %1689 = vmatpush3.bf16.msra.mxu1 %v1881_v12 }
  0x3e   : > { %1690 = vmatprep.subr.bf16.mxu1 %v1882_v13 }
  0x3f   : > { %1719 = vmatpush3.bf16.msra.mxu0 %v1888_v20  ;;  %v1894_v20 = vld [vmem:[#allocation2 + $0x88] sm:$0xff]  }
  0x40   : > { %1720 = vmatprep.subr.bf16.mxu0 %v1889_v21 }
  0x41   : > { %1691 = vmatpush3.bf16.msra.mxu1 %v1882_v13 }
  0x42   : > { %1673 = vmatmul.mubr.msk.bf16.gmra.mrb[8].mxu0 %vm343_vm0, %v1874_v10  ;;  %1692 = vmatprep.subr.bf16.mxu1 %v1883_v15 }
  0x43   : > { %1676 = vmatprep.mubr.msk.bf16.mxu0 %vm343_vm0, %v1875_v11  ;;  %1721 = vmatpush3.bf16.msra.mxu0 %v1889_v21 }
  0x44   : > { %1722 = vmatprep.subr.bf16.mxu0 %v1890_v22 }
  0x45   : > { %1693 = vmatpush3.bf16.msra.mxu1 %v1883_v15 }
  0x46   : > { %1694 = vmatprep.subr.bf16.mxu1 %v1884_v16 }
  0x47   : > { %1723 = vmatpush3.bf16.msra.mxu0 %v1890_v22 }
  0x48   : > { %1724 = vmatprep.subr.bf16.mxu0 %v1891_v63 }
  0x49   : > { %1695 = vmatpush3.bf16.msra.mxu1 %v1884_v16 }
  0x4a   : > { %1677 = vmatmul.mubr.msk.bf16.gmra.mrb[12].mxu0 %vm343_vm0, %v1876_v14 }
  0x4b   : > { %1725 = vmatpush3.bf16.msra.mxu0 %v1891_v63 }
  0x4c   : > { %1726 = vmatprep.subr.bf16.mxu0 %v1892_v0 }
  0x4f   : > { %1727 = vmatpush3.bf16.msra.mxu0 %v1892_v0  ;;  %v1899_v0 = vld [vmem:[#allocation2 + $0xb0] sm:$0xff]  }
  0x50   : > { %1764 = vmatprep.subr.bf16.mxu0 %v1893_v1 }
 0x105   : > { %v1666_v23 = vpop.f32.mrb[0].mxu0 }
 0x106   : > { %v402_v24 = vpop.f32.mrb[1].mxu0  ;;  %v467_v26 = vmax.f32 %v1666_v23, 0.0 }
 0x107   : > { %v1667_v25 = vpop.f32.mrb[2].mxu0  ;;  %v465_v29 = vmax.f32 %v402_v24, 0.0 }
 0x108   : > { %v468_v27 = vmax.f32 %v1667_v25, 0.0  ;;  %v405_v28 = vpop.f32.mrb[3].mxu0 }
 0x109   : > { %v466_v30 = vmax.f32 %v405_v28, 0.0  ;;  %v1895_v28 = vld [vmem:[#allocation2 + $0x90] sm:$0xff]  }
 0x10a   : > { %v482_v31 = vpack.c.bf16 %v468_v27, %v467_v26 }
 0x10b   : > { %v481_v32 = vpack.c.bf16 %v466_v30, %v465_v29 }
 0x10d   : > { %v1670_v33 = vpop.f32.mrb[4].mxu0  ;;  %1696 = vmatprep.mubr.bf16.mxu1 %v481_v32 }
 0x10e   : > { %v418_v34 = vpop.f32.mrb[5].mxu0  ;;  %1697 = vmatmul.mubr.bf16.vlgmr.msra.gmra.mrb[0].mxu1 %v482_v31  ;;  %v471_v36 = vmax.f32 %v1670_v33, 0.0 }
 0x10f   : > { %v1671_v35 = vpop.f32.mrb[6].mxu0  ;;  %v469_v39 = vmax.f32 %v418_v34, 0.0 }
 0x110   : > { %v472_v37 = vmax.f32 %v1671_v35, 0.0  ;;  %v421_v38 = vpop.f32.mrb[7].mxu0 }
 0x111   : > { %v470_v40 = vmax.f32 %v421_v38, 0.0 }
 0x112   : > { %v484_v41 = vpack.c.bf16 %v472_v37, %v471_v36  ;;  %v1896_v36 = vld [vmem:[#allocation2 + $0x98] sm:$0xff]  }
 0x113   : > { %v483_v42 = vpack.c.bf16 %v470_v40, %v469_v39 }
 0x115   : > { %v1674_v43 = vpop.f32.mrb[8].mxu0  ;;  %1700 = vmatprep.mubr.bf16.mxu1 %v483_v42 }
 0x116   : > { %v434_v44 = vpop.f32.mrb[9].mxu0  ;;  %1701 = vmatmul.mubr.bf16.gmra.mrb[4].mxu1 %v484_v41  ;;  %v475_v46 = vmax.f32 %v1674_v43, 0.0 }
 0x117   : > { %v1675_v45 = vpop.f32.mrb[10].mxu0  ;;  %v473_v49 = vmax.f32 %v434_v44, 0.0  ;;  %v1897_v44 = vld [vmem:[#allocation2 + $0xa0] sm:$0xff]  }
 0x118   : > { %v476_v47 = vmax.f32 %v1675_v45, 0.0  ;;  %v437_v48 = vpop.f32.mrb[11].mxu0 }
 0x119   : > { %v474_v50 = vmax.f32 %v437_v48, 0.0 }
 0x11a   : > { %v486_v51 = vpack.c.bf16 %v476_v47, %v475_v46 }
 0x11b   : > { %v485_v52 = vpack.c.bf16 %v474_v50, %v473_v49 }
 0x11d   : > { %v1678_v53 = vpop.f32.mrb[12].mxu0  ;;  %1704 = vmatprep.mubr.bf16.mxu1 %v485_v52  ;;  %v1898_v52 = vld [vmem:[#allocation2 + $0xa8] sm:$0xff]  }
 0x11e   : > { %v450_v54 = vpop.f32.mrb[13].mxu0  ;;  %1705 = vmatmul.mubr.bf16.gmra.mrb[8].mxu1 %v486_v51  ;;  %v479_v56 = vmax.f32 %v1678_v53, 0.0 }
 0x11f   : > { %v1679_v55 = vpop.f32.mrb[14].mxu0  ;;  %v477_v59 = vmax.f32 %v450_v54, 0.0 }
 0x120   : > { %v480_v57 = vmax.f32 %v1679_v55, 0.0  ;;  %v453_v58 = vpop.f32.mrb[15].mxu0 }
 0x121   : > { %v478_v60 = vmax.f32 %v453_v58, 0.0 }
 0x122   : > { %v488_v61 = vpack.c.bf16 %v480_v57, %v479_v56 }
 0x123   : > { %v487_v62 = vpack.c.bf16 %v478_v60, %v477_v59 }
 0x125   : > { %1708 = vmatprep.mubr.bf16.mxu1 %v487_v62 }
 0x126   : > { %1709 = vmatmul.mubr.bf16.gmra.mrb[12].mxu1 %v488_v61 }
 0x1e1   : > { %v1698_v3 = vpop.f32.mrb[0].mxu1 }
 0x1e2   : > { %v600_v4 = vadd.f32 %v1698_v3, %v2078_v2  ;;  %v591_v5 = vpop.f32.mrb[1].mxu1  ;;  %v1901_v3 = vld [vmem:[#allocation2 + $0xc0] sm:$0xff]  }
 0x1e3   : > { %v592_v6 = vadd.f32 %v2078_v2, %v591_v5  ;;  %v1699_v7 = vpop.f32.mrb[2].mxu1  ;;  %v1903_v5 = vld [vmem:[#allocation2 + $0xd0] sm:$0xff]  }
 0x1e4   : > { %v603_v8 = vadd.f32 %v1699_v7, %v2078_v2  ;;  %v594_v9 = vpop.f32.mrb[3].mxu1  ;;  %v656_v11 = vmax.f32 %v600_v4, 0.0  ;;  %v1960_v4 = vmov 0.0   ;;  %v1905_v7 = vld [vmem:[#allocation2 + $0xe0] sm:$0xff]  }
 0x1e5   : > { %v595_v10 = vadd.f32 %v2078_v2, %v594_v9  ;;  %v654_v13 = vmax.f32 %v592_v6, 0.0  ;;  %1744 = vmatprep.subr.bf16.mxu1 %v1960_v4  ;;  %v1904_v6 = vld [vmem:[#allocation2 + $0xd8] sm:$0xff]   ;;  %v1907_v9 = vld [vmem:[#allocation2 + $0xf0] sm:$0xff]   ;;  %1760 = vmatprep.mubr.msk.bf16.mxu1 %vm1961_vm1, %v1960_v4 }
 0x1e6   : > { %v657_v12 = vmax.f32 %v603_v8, 0.0  ;;  %1745 = vmatpush3.bf16.msra.mxu1 %v1901_v3  ;;  %v1906_v8 = vld [vmem:[#allocation2 + $0xe8] sm:$0xff]  }
 0x1e7   : > { %v655_v14 = vmax.f32 %v595_v10, 0.0  ;;  %1746 = vmatprep.subr.bf16.mxu1 %v1960_v4  ;;  %v1908_v10 = vld [vmem:[#allocation2 + $0xf8] sm:$0xff]  }
 0x1e8   : > { %v671_v15 = vpack.c.bf16 %v657_v12, %v656_v11  ;;  %v2099_v11 = vld [vmem:[%s2192_s4 + $0x1] ss:$0 sm:$0xff] }
 0x1e9   : > { %v670_v16 = vpack.c.bf16 %v655_v14, %v654_v13  ;;  %v1702_v17 = vpop.f32.mrb[4].mxu1 }
 0x1ea   : > { %v616_v18 = vadd.f32 %v1702_v17, %v2078_v2  ;;  %v607_v19 = vpop.f32.mrb[5].mxu1 }
 0x1eb   : > { %v608_v21 = vadd.f32 %v2078_v2, %v607_v19  ;;  %v1703_v22 = vpop.f32.mrb[6].mxu1  ;;  %1728 = vmatprep.mubr.bf16.mxu0 %v670_v16 }
 0x1ec   : > { %v619_v23 = vadd.f32 %v1703_v22, %v2078_v2  ;;  %v610_v24 = vpop.f32.mrb[7].mxu1  ;;  %1729 = vmatmul.mubr.bf16.vlgmr.msra.gmra.mrb[16].mxu0 %v671_v15  ;;  %v660_v26 = vmax.f32 %v616_v18, 0.0 }
 0x1ed   : > { %v611_v25 = vadd.f32 %v2078_v2, %v610_v24  ;;  %1765 = vmatpush3.bf16.msra.mxu0 %v1893_v1  ;;  %v658_v29 = vmax.f32 %v608_v21, 0.0  ;;  %v1900_v1 = vld [vmem:[#allocation2 + $0xb8] sm:$0xff]  }
 0x1ee   : > { %v661_v27 = vmax.f32 %v619_v23, 0.0  ;;  %1766 = vmatprep.subr.bf16.mxu0 %v1894_v20 }
 0x1ef   : > { %v659_v30 = vmax.f32 %v611_v25, 0.0 }
 0x1f0   : > { %v673_v31 = vpack.c.bf16 %v661_v27, %v660_v26 }
 0x1f1   : > { %v672_v32 = vpack.c.bf16 %v659_v30, %v658_v29  ;;  %v1706_v33 = vpop.f32.mrb[8].mxu1  ;;  %1767 = vmatpush3.bf16.msra.mxu0 %v1894_v20 }
 0x1f2   : > { %v632_v34 = vadd.f32 %v1706_v33, %v2078_v2  ;;  %v623_v35 = vpop.f32.mrb[9].mxu1  ;;  %1768 = vmatprep.subr.bf16.mxu0 %v1895_v28 }
 0x1f3   : > { %v624_v37 = vadd.f32 %v2078_v2, %v623_v35  ;;  %v1707_v38 = vpop.f32.mrb[10].mxu1  ;;  %1732 = vmatprep.mubr.bf16.mxu0 %v672_v32 }
 0x1f4   : > { %v635_v39 = vadd.f32 %v1707_v38, %v2078_v2  ;;  %v626_v40 = vpop.f32.mrb[11].mxu1  ;;  %1733 = vmatmul.mubr.bf16.gmra.mrb[20].mxu0 %v673_v31  ;;  %v664_v42 = vmax.f32 %v632_v34, 0.0 }
 0x1f5   : > { %v627_v41 = vadd.f32 %v2078_v2, %v626_v40  ;;  %1769 = vmatpush3.bf16.msra.mxu0 %v1895_v28  ;;  %v662_v45 = vmax.f32 %v624_v37, 0.0 }
 0x1f6   : > { %v665_v43 = vmax.f32 %v635_v39, 0.0  ;;  %1770 = vmatprep.subr.bf16.mxu0 %v1896_v36 }
 0x1f7   : > { %v663_v46 = vmax.f32 %v627_v41, 0.0 }
 0x1f8   : > { %v675_v47 = vpack.c.bf16 %v665_v43, %v664_v42 }
 0x1f9   : > { %v674_v48 = vpack.c.bf16 %v663_v46, %v662_v45  ;;  %v1710_v49 = vpop.f32.mrb[12].mxu1  ;;  %1771 = vmatpush3.bf16.msra.mxu0 %v1896_v36 }
 0x1fa   : > { %v648_v50 = vadd.f32 %v1710_v49, %v2078_v2  ;;  %v639_v51 = vpop.f32.mrb[13].mxu1  ;;  %1772 = vmatprep.subr.bf16.mxu0 %v1897_v44 }
 0x1fb   : > { %v640_v53 = vadd.f32 %v2078_v2, %v639_v51  ;;  %v1711_v54 = vpop.f32.mrb[14].mxu1  ;;  %1736 = vmatprep.mubr.bf16.mxu0 %v674_v48 }
 0x1fc   : > { %v651_v55 = vadd.f32 %v1711_v54, %v2078_v2  ;;  %v642_v56 = vpop.f32.mrb[15].mxu1  ;;  %1737 = vmatmul.mubr.bf16.gmra.mrb[24].mxu0 %v675_v47  ;;  %v668_v58 = vmax.f32 %v648_v50, 0.0 }
 0x1fd   : > { %v643_v57 = vadd.f32 %v2078_v2, %v642_v56  ;;  %1773 = vmatpush3.bf16.msra.mxu0 %v1897_v44  ;;  %v666_v60 = vmax.f32 %v640_v53, 0.0  ;;  %v1902_v2 = vld [vmem:[#allocation2 + $0xc8] sm:$0xff]  }
 0x1fe   : > { %v669_v59 = vmax.f32 %v651_v55, 0.0  ;;  %1774 = vmatprep.subr.bf16.mxu0 %v1898_v52  ;;  %1747 = vmatpush3.bf16.msra.mxu1 %v1902_v2 }
 0x1ff   : > { %v667_v61 = vmax.f32 %v643_v57, 0.0  ;;  %1748 = vmatprep.subr.bf16.mxu1 %v1960_v4 }
 0x200   : > { %v677_v62 = vpack.c.bf16 %v669_v59, %v668_v58 }
 0x201   : > { %v676_v63 = vpack.c.bf16 %v667_v61, %v666_v60  ;;  %1775 = vmatpush3.bf16.msra.mxu0 %v1898_v52 }
 0x202   : > { %1776 = vmatprep.subr.bf16.mxu0 %v1899_v0  ;;  %1749 = vmatpush3.bf16.msra.mxu1 %v1903_v5 }
 0x203   : > { %1740 = vmatprep.mubr.bf16.mxu0 %v676_v63  ;;  %1750 = vmatprep.subr.bf16.mxu1 %v1960_v4 }
 0x204   : > { %1741 = vmatmul.mubr.bf16.gmra.mrb[28].mxu0 %v677_v62 }
 0x205   : > { %1777 = vmatpush3.bf16.msra.mxu0 %v1899_v0 }
 0x206   : > { %1778 = vmatprep.subr.bf16.mxu0 %v1900_v1  ;;  %1751 = vmatpush3.bf16.msra.mxu1 %v1904_v6 }
 0x207   : > { %1752 = vmatprep.subr.bf16.mxu1 %v1960_v4 }
 0x209   : > { %1779 = vmatpush3.bf16.msra.mxu0 %v1900_v1 }
 0x20a   : > { %1753 = vmatpush3.bf16.msra.mxu1 %v1905_v7 }
 0x20b   : > { %1754 = vmatprep.subr.bf16.mxu1 %v1960_v4 }
 0x20e   : > { %1755 = vmatpush3.bf16.msra.mxu1 %v1906_v8 }
 0x20f   : > { %1756 = vmatprep.subr.bf16.mxu1 %v1960_v4 }
 0x212   : > { %1757 = vmatpush3.bf16.msra.mxu1 %v1907_v9 }
 0x213   : > { %1758 = vmatprep.subr.bf16.mxu1 %v1960_v4 }
 0x216   : > { %1759 = vmatpush3.bf16.msra.mxu1 %v1908_v10 }
 0x2bf   : > { %v1730_v12 = vpop.f32.mrb[16].mxu0 }
 0x2c0   : > { %v790_v13 = vadd.f32 %v1730_v12, %v2099_v11  ;;  %v781_v14 = vpop.f32.mrb[17].mxu0 }
 0x2c1   : > { %v782_v15 = vadd.f32 %v2099_v11, %v781_v14  ;;  %v1731_v16 = vpop.f32.mrb[18].mxu0 }
 0x2c2   : > { %v846_v17 = vmax.f32 %v790_v13, 0.0  ;;  %v793_v18 = vadd.f32 %v1731_v16, %v2099_v11  ;;  %v784_v19 = vpop.f32.mrb[19].mxu0 }
 0x2c3   : > { %v844_v20 = vmax.f32 %v782_v15, 0.0  ;;  %v785_v21 = vadd.f32 %v2099_v11, %v784_v19 }
 0x2c4   : > { %v847_v22 = vmax.f32 %v793_v18, 0.0 }
 0x2c5   : > { %v860_v23 = vmax.f32 %v844_v20, %v846_v17  ;;  %v845_v24 = vmax.f32 %v785_v21, 0.0 }
 0x2c6   : > { %v1002_v25 = vpack.c.bf16 %v847_v22, %v846_v17 }
 0x2c7   : > { %v861_v26 = vmax.f32 %v845_v24, %v847_v22  ;;  %v1001_v27 = vpack.c.bf16 %v845_v24, %v844_v20  ;;  %v1734_v28 = vpop.f32.mrb[20].mxu0 }
 0x2c8   : > { %v806_v29 = vadd.f32 %v1734_v28, %v2099_v11  ;;  %v797_v30 = vpop.f32.mrb[21].mxu0 }
 0x2c9   : > { %v798_v31 = vadd.f32 %v2099_v11, %v797_v30  ;;  %v1735_v32 = vpop.f32.mrb[22].mxu0  ;;  %1780 = vmatprep.mubr.bf16.mxu0 %v1001_v27 }
 0x2ca   : > { %v809_v33 = vadd.f32 %v1735_v32, %v2099_v11  ;;  %v800_v34 = vpop.f32.mrb[23].mxu0  ;;  %1781 = vmatmul.mubr.bf16.vlgmr.msra.gmra.mrb[32].mxu0 %v1002_v25  ;;  %v850_v37 = vmax.f32 %v806_v29, 0.0 }
 0x2cb   : > { %v848_v35 = vmax.f32 %v798_v31, 0.0  ;;  %v801_v36 = vadd.f32 %v2099_v11, %v800_v34 }
 0x2cc   : > { %v851_v38 = vmax.f32 %v809_v33, 0.0 }
 0x2cd   : > { %v862_v39 = vmax.f32 %v860_v23, %v848_v35  ;;  %v849_v40 = vmax.f32 %v801_v36, 0.0  ;;  %v1909_v36 = vld [vmem:[%s2191_s3] sm:$0xff]  }
 0x2ce   : > { %v1004_v41 = vpack.c.bf16 %v851_v38, %v850_v37  ;;  %1796 = vmatprep.subr.bf16.mxu0 %v1909_v36  ;;  %1828 = vmatprep.subr.bf16.mxu1 %v1909_v36 }
 0x2cf   : > { %v864_v42 = vmax.f32 %v862_v39, %v850_v37  ;;  %v863_v43 = vmax.f32 %v861_v26, %v849_v40  ;;  %v1003_v44 = vpack.c.bf16 %v849_v40, %v848_v35  ;;  %v1738_v45 = vpop.f32.mrb[24].mxu0  ;;  %v1910_v37 = vld [vmem:[%s2191_s3 + $0x8] sm:$0xff]   ;;  %1797 = vmatpush3.bf16.msra.mxu0 %v1909_v36  ;;  %v1912_v39 = vld [vmem:[%s2191_s3 + $0x18] sm:$0xff]   ;;  %v1913_v40 = vld [vmem:[%s2191_s3 + $0x20] sm:$0xff]  }
 0x2d0   : > { %v822_v46 = vadd.f32 %v1738_v45, %v2099_v11  ;;  %v813_v47 = vpop.f32.mrb[25].mxu0  ;;  %1798 = vmatprep.subr.bf16.mxu0 %v1910_v37 }
 0x2d1   : > { %v865_v48 = vmax.f32 %v863_v43, %v851_v38  ;;  %v814_v49 = vadd.f32 %v2099_v11, %v813_v47  ;;  %v1739_v50 = vpop.f32.mrb[26].mxu0  ;;  %1784 = vmatprep.mubr.bf16.mxu0 %v1003_v44  ;;  %v1911_v38 = vld [vmem:[%s2191_s3 + $0x10] sm:$0xff]   ;;  %v1916_v43 = vld [vmem:[%s2191_s3 + $0x38] sm:$0xff]  }
 0x2d2   : > { %v854_v51 = vmax.f32 %v822_v46, 0.0  ;;  %v825_v52 = vadd.f32 %v1739_v50, %v2099_v11  ;;  %v816_v53 = vpop.f32.mrb[27].mxu0  ;;  %1785 = vmatmul.mubr.bf16.gmra.mrb[36].mxu0 %v1004_v41  ;;  %v1914_v41 = vld [vmem:[%s2191_s3 + $0x28] sm:$0xff]  }
 0x2d3   : > { %v866_v54 = vmax.f32 %v864_v42, %v865_v48  ;;  %v852_v55 = vmax.f32 %v814_v49, 0.0  ;;  %v817_v56 = vadd.f32 %v2099_v11, %v816_v53  ;;  %1799 = vmatpush3.bf16.msra.mxu0 %v1910_v37  ;;  %v1915_v42 = vld [vmem:[%s2191_s3 + $0x30] sm:$0xff]  }
 0x2d4   : > { %v855_v57 = vmax.f32 %v825_v52, 0.0  ;;  %1800 = vmatprep.subr.bf16.mxu0 %v1911_v38 }
 0x2d5   : > { %v873_v58 = vmax.f32 %v852_v55, %v854_v51  ;;  %v853_v59 = vmax.f32 %v817_v56, 0.0  ;;  %v867_v61 = vrot.slane %v866_v54, 4 }
 0x2d6   : > { %v1006_v60 = vpack.c.bf16 %v855_v57, %v854_v51 }
 0x2d7   : > { %v874_v62 = vmax.f32 %v853_v59, %v855_v57  ;;  %v1005_v63 = vpack.c.bf16 %v853_v59, %v852_v55  ;;  %v1742_v0 = vpop.f32.mrb[28].mxu0  ;;  %v868_v7 = vmax.f32 %v866_v54, %v867_v61  ;;  %1801 = vmatpush3.bf16.msra.mxu0 %v1911_v38 }
 0x2d8   : > { %v838_v1 = vadd.f32 %v1742_v0, %v2099_v11  ;;  %v829_v3 = vpop.f32.mrb[29].mxu0  ;;  %1802 = vmatprep.subr.bf16.mxu0 %v1912_v39 }
 0x2d9   : > { %v830_v4 = vadd.f32 %v2099_v11, %v829_v3  ;;  %v1743_v2 = vpop.f32.mrb[30].mxu0  ;;  %1788 = vmatprep.mubr.bf16.mxu0 %v1005_v63  ;;  %v869_v16 = vrot.slane %v868_v7, 2  ;;  %v1558_v3 = vld [vmem:[%s2192_s4 + $0x2] ss:$0 sm:$0xff] }
 0x2da   : > { %v841_v5 = vadd.f32 %v1743_v2, %v2099_v11  ;;  %v832_v6 = vpop.f32.mrb[31].mxu0  ;;  %1789 = vmatmul.mubr.bf16.gmra.mrb[40].mxu0 %v1006_v60  ;;  %v858_v10 = vmax.f32 %v838_v1, 0.0  ;;  %v1962_v60 = vmov 1966171168  }
 0x2db   : > { %v856_v8 = vmax.f32 %v830_v4, 0.0  ;;  %v833_v9 = vadd.f32 %v2099_v11, %v832_v6  ;;  %v870_v21 = vmax.f32 %v868_v7, %v869_v16  ;;  %1803 = vmatpush3.bf16.msra.mxu0 %v1912_v39  ;;  %v1177_v61 = vunpack.c.l.s4 %v1962_v60 }
 0x2dc   : > { %v859_v12 = vmax.f32 %v841_v5, 0.0  ;;  %1804 = vmatprep.subr.bf16.mxu0 %v1913_v40 }
 0x2dd   : > { %v875_v13 = vmax.f32 %v873_v58, %v856_v8  ;;  %v857_v14 = vmax.f32 %v833_v9, 0.0  ;;  %v871_v24 = vrot.slane %v870_v21, 1  ;;  %v1178_v63 = vunpack.c.0.s8 %v1177_v61 }
 0x2de   : > { %v1008_v15 = vpack.c.bf16 %v859_v12, %v858_v10 }
 0x2df   : > { %v877_v17 = vmax.f32 %v875_v13, %v858_v10  ;;  %v876_v18 = vmax.f32 %v874_v62, %v857_v14  ;;  %v1007_v19 = vpack.c.bf16 %v857_v14, %v856_v8  ;;  %v872_v27 = vmax.f32 %v870_v21, %v871_v24  ;;  %1805 = vmatpush3.bf16.msra.mxu0 %v1913_v40 }
 0x2e0   : > { %1806 = vmatprep.subr.bf16.mxu0 %v1914_v41  ;;  %v1179_v62 = vlaneseq }
 0x2e1   : > { %v878_v20 = vmax.f32 %v876_v18, %v859_v12  ;;  %1792 = vmatprep.mubr.bf16.mxu0 %v1007_v19  ;;  %v886_v29 = vpack.c.bf16 %v872_v27, %v872_v27 }
 0x2e2   : > { %1793 = vmatmul.mubr.bf16.gmra.mrb[44].mxu0 %v1008_v15  ;;  %v1180_v0 = vshrl.u32 %v1179_v62, 7 }
 0x2e3   : > { %v879_v22 = vmax.f32 %v877_v17, %v878_v20  ;;  %v907_v32 = vunpack.c.l.b16 %v886_v29  ;;  %1807 = vmatpush3.bf16.msra.mxu0 %v1914_v41 }
 0x2e4   : > { %1808 = vmatprep.subr.bf16.mxu0 %v1915_v42  ;;  %v1181_v1 = vsub.s32 %v1178_v63, %v1180_v0  ;;  %v1200_v5 = vsub.s32 0, %v1180_v0 }
 0x2e5   : > { %v880_v23 = vrot.slane %v879_v22, 4 }
 0x2e7   : > { %v881_v25 = vmax.f32 %v879_v22, %v880_v23  ;;  %1809 = vmatpush3.bf16.msra.mxu0 %v1915_v42 }
 0x2e8   : > { %1810 = vmatprep.subr.bf16.mxu0 %v1916_v43 }
 0x2e9   : > { %v882_v26 = vrot.slane %v881_v25, 2 }
 0x2eb   : > { %v883_v11 = vmax.f32 %v881_v25, %v882_v26  ;;  %1811 = vmatpush3.bf16.msra.mxu0 %v1916_v43 }
 0x2ed   : > { %v884_v28 = vrot.slane %v883_v11, 1 }
 0x2ef   : > { %v885_v30 = vmax.f32 %v883_v11, %v884_v28 }
 0x2f1   : > { %v887_v31 = vpack.c.bf16 %v885_v30, %v885_v30 }
 0x2f3   : > { %v908_v33 = vunpack.c.l.b16 %v887_v31 }
 0x2f5   : > { %v910_v34 = vsel %vm909_vm2, %v908_v33, %v907_v32 }
 0x2f6   : > { %v911_v35 = vpack.c.b16 %v910_v34, %v910_v34 }
 0x2f8   : > { %1761 = vmatmul.mubr.bf16.vlgmr.msra.gmra.mrb[16].mxu1 %v911_v35 }
 0x2f9   : > { %1836 = vmatpush3.bf16.msra.mxu1 %v1909_v36 }
 0x2fa   : > { %1829 = vmatprep.subr.bf16.mxu1 %v1910_v37 }
 0x2fd   : > { %1837 = vmatpush3.bf16.msra.mxu1 %v1910_v37 }
 0x2fe   : > { %1830 = vmatprep.subr.bf16.mxu1 %v1911_v38 }
 0x301   : > { %1838 = vmatpush3.bf16.msra.mxu1 %v1911_v38 }
 0x302   : > { %1831 = vmatprep.subr.bf16.mxu1 %v1912_v39 }
 0x305   : > { %1839 = vmatpush3.bf16.msra.mxu1 %v1912_v39 }
 0x306   : > { %1832 = vmatprep.subr.bf16.mxu1 %v1913_v40 }
 0x309   : > { %1840 = vmatpush3.bf16.msra.mxu1 %v1913_v40 }
 0x30a   : > { %1833 = vmatprep.subr.bf16.mxu1 %v1914_v41 }
 0x30d   : > { %1841 = vmatpush3.bf16.msra.mxu1 %v1914_v41 }
 0x30e   : > { %1834 = vmatprep.subr.bf16.mxu1 %v1915_v42 }
 0x311   : > { %1842 = vmatpush3.bf16.msra.mxu1 %v1915_v42 }
 0x312   : > { %1835 = vmatprep.subr.bf16.mxu1 %v1916_v43 }
 0x315   : > { %1843 = vmatpush3.bf16.msra.mxu1 %v1916_v43 }
 0x39d   : > { %v1782_v44 = vpop.f32.mrb[32].mxu0 }
 0x39e   : > { %v1112_v45 = vpop.f32.mrb[33].mxu0  ;;  %v1121_v7 = vadd.f32 %v1782_v44, %v1558_v3 }
 0x39f   : > { %v1783_v46 = vpop.f32.mrb[34].mxu0  ;;  %v1113_v8 = vadd.f32 %v1558_v3, %v1112_v45 }
 0x3a0   : > { %v1115_v47 = vpop.f32.mrb[35].mxu0  ;;  %v1124_v9 = vadd.f32 %v1783_v46, %v1558_v3 }
 0x3a1   : > { %v1116_v10 = vadd.f32 %v1558_v3, %v1115_v47 }
 0x3a5   : > { %v1786_v48 = vpop.f32.mrb[36].mxu0 }
 0x3a6   : > { %v1128_v49 = vpop.f32.mrb[37].mxu0  ;;  %v1137_v13 = vadd.f32 %v1786_v48, %v1558_v3 }
 0x3a7   : > { %v1787_v50 = vpop.f32.mrb[38].mxu0  ;;  %v1129_v14 = vadd.f32 %v1558_v3, %v1128_v49 }
 0x3a8   : > { %v1131_v51 = vpop.f32.mrb[39].mxu0  ;;  %v1140_v18 = vadd.f32 %v1787_v50, %v1558_v3 }
 0x3a9   : > { %v1132_v19 = vadd.f32 %v1558_v3, %v1131_v51 }
 0x3ad   : > { %v1790_v52 = vpop.f32.mrb[40].mxu0 }
 0x3ae   : > { %v1144_v53 = vpop.f32.mrb[41].mxu0  ;;  %v1153_v20 = vadd.f32 %v1790_v52, %v1558_v3 }
 0x3af   : > { %v1791_v54 = vpop.f32.mrb[42].mxu0  ;;  %v1145_v21 = vadd.f32 %v1558_v3, %v1144_v53 }
 0x3b0   : > { %v1147_v55 = vpop.f32.mrb[43].mxu0  ;;  %v1156_v22 = vadd.f32 %v1791_v54, %v1558_v3 }
 0x3b1   : > { %v1148_v23 = vadd.f32 %v1558_v3, %v1147_v55 }
 0x3b5   : > { %v1794_v56 = vpop.f32.mrb[44].mxu0 }
 0x3b6   : > { %v1160_v57 = vpop.f32.mrb[45].mxu0  ;;  %v1169_v26 = vadd.f32 %v1794_v56, %v1558_v3 }
 0x3b7   : > { %v1795_v58 = vpop.f32.mrb[46].mxu0  ;;  %v1161_v27 = vadd.f32 %v1558_v3, %v1160_v57 }
 0x3b8   : > { %v1163_v59 = vpop.f32.mrb[47].mxu0  ;;  %v1172_v11 = vadd.f32 %v1795_v58, %v1558_v3 }
 0x3b9   : > { %v1164_v28 = vadd.f32 %v1558_v3, %v1163_v59 }
 0x3cb   : > { %v995_v4 = vpop.f32.mrb[16].mxu1 }
 0x3cc   : > { %v1182_v2 = vrot.slane %v995_v4, %v1181_v1  ;;  %v1762_v6 = vpop.f32.mrb[17].mxu1 }
 0x3cd   : > { %v998_v12 = vpop.f32.mrb[18].mxu1  ;;  %v1567_v6 = vld [vmem:[%s2193_s5] ss:$0 sm:$0xff] }
 0x3ce   : > { %v1183_v15 = vcombine.high %v1182_v2, %v1182_v2  ;;  %v1190_v16 = vrot.slane %v1182_v2, %v1181_v1  ;;  %v1763_v17 = vpop.f32.mrb[19].mxu1 }
 0x3d0   : > { %v1197_v24 = vrot.slane %v1183_v15, %v1181_v1  ;;  %v1201_v25 = vrot.slane %v1190_v16, %v1200_v5 }
 0x3d2   : > { %v1205_v29 = vrot.slane %v1197_v24, %v1200_v5  ;;  %v1208_v30 = vadd.f32 %v1201_v25, %v1113_v8  ;;  %v1209_v31 = vadd.f32 %v1201_v25, %v1116_v10  ;;  %v1212_v32 = vadd.f32 %v1201_v25, %v1129_v14 }
 0x3d3   : > { %v1213_v33 = vadd.f32 %v1201_v25, %v1132_v19  ;;  %v1210_v34 = vadd.f32 %v1201_v25, %v1121_v7  ;;  %v1211_v35 = vadd.f32 %v1201_v25, %v1124_v9  ;;  %v1214_v36 = vadd.f32 %v1201_v25, %v1137_v13 }
 0x3d4   : > { %v1224_v37 = vmax.f32 %v1208_v30, 0.0  ;;  %v1225_v38 = vmax.f32 %v1209_v31, 0.0  ;;  %v1228_v39 = vmax.f32 %v1212_v32, 0.0  ;;  %v1215_v40 = vadd.f32 %v1201_v25, %v1140_v18 }
 0x3d5   : > { %v1229_v41 = vmax.f32 %v1213_v33, 0.0  ;;  %v1226_v42 = vmax.f32 %v1210_v34, 0.0  ;;  %v1227_v43 = vmax.f32 %v1211_v35, 0.0  ;;  %v1230_v44 = vmax.f32 %v1214_v36, 0.0 }
 0x3d6   : > { %v1240_v45 = vpack.c.bf16 %v1225_v38, %v1224_v37  ;;  %v1231_v46 = vmax.f32 %v1215_v40, 0.0  ;;  %v1216_v47 = vadd.f32 %v1205_v29, %v1145_v21  ;;  %v1217_v48 = vadd.f32 %v1205_v29, %v1148_v23 }
 0x3d7   : > { %v1242_v49 = vpack.c.bf16 %v1229_v41, %v1228_v39  ;;  %v1241_v50 = vpack.c.bf16 %v1227_v43, %v1226_v42  ;;  %v1218_v51 = vadd.f32 %v1205_v29, %v1153_v20  ;;  %v1219_v52 = vadd.f32 %v1205_v29, %v1156_v22 }
 0x3d8   : > { %1812 = vmatprep.mubr.bf16.mxu0 %v1240_v45  ;;  %v1243_v53 = vpack.c.bf16 %v1231_v46, %v1230_v44  ;;  %v1232_v54 = vmax.f32 %v1216_v47, 0.0  ;;  %v1233_v55 = vmax.f32 %v1217_v48, 0.0  ;;  %v1220_v56 = vadd.f32 %v1205_v29, %v1161_v27 }
 0x3d9   : > { %1816 = vmatprep.mubr.bf16.mxu1 %v1242_v49  ;;  %1813 = vmatmul.mubr.bf16.vlgmr.msra.gmra.mrb[48].mxu0 %v1241_v50  ;;  %v1234_v57 = vmax.f32 %v1218_v51, 0.0  ;;  %v1235_v58 = vmax.f32 %v1219_v52, 0.0  ;;  %v1221_v59 = vadd.f32 %v1205_v29, %v1164_v28  ;;  %v1222_v60 = vadd.f32 %v1205_v29, %v1169_v26 }
 0x3da   : > { %1817 = vmatmul.mubr.bf16.vlgmr.msra.gmra.mrb[20].mxu1 %v1243_v53  ;;  %v1244_v61 = vpack.c.bf16 %v1233_v55, %v1232_v54  ;;  %v1236_v62 = vmax.f32 %v1220_v56, 0.0  ;;  %v1223_v63 = vadd.f32 %v1205_v29, %v1172_v11 }
 0x3db   : > { %v1245_v0 = vpack.c.bf16 %v1235_v58, %v1234_v57  ;;  %v1237_v1 = vmax.f32 %v1221_v59, 0.0  ;;  %v1238_v3 = vmax.f32 %v1222_v60, 0.0 }
 0x3dc   : > { %1820 = vmatprep.mubr.bf16.mxu1 %v1244_v61  ;;  %v1239_v4 = vmax.f32 %v1223_v63, 0.0 }
 0x3dd   : > { %v1246_v2 = vpack.c.bf16 %v1237_v1, %v1236_v62 }
 0x3de   : > { %v1247_v5 = vpack.c.bf16 %v1239_v4, %v1238_v3 }
 0x3e2   : > { %1821 = vmatmul.mubr.bf16.gmra.mrb[24].mxu1 %v1245_v0 }
 0x3e3   : > { %1824 = vmatprep.mubr.bf16.mxu1 %v1246_v2 }
 0x3ea   : > { %1825 = vmatmul.mubr.bf16.gmra.mrb[28].mxu1 %v1247_v5 }
 0x4ac   : > { %v1814_v7 = vpop.f32.mrb[48].mxu0 }
 0x4ad   : > { %v1362_v8 = vadd.f32 %v1814_v7, %v1567_v6  ;;  %v1818_v9 = vpop.f32.mrb[20].mxu1  ;;  %v1353_v10 = vpop.f32.mrb[49].mxu0 }
 0x4ae   : > { %v1378_v12 = vadd.f32 %v1818_v9, %v1567_v6  ;;  %v1354_v13 = vadd.f32 %v1567_v6, %v1353_v10  ;;  %v1369_v14 = vpop.f32.mrb[21].mxu1  ;;  %v1815_v15 = vpop.f32.mrb[50].mxu0 }
 0x4af   : > { %1418 = vst.msk [vmem:[%s2151_s29 + $0x10] sm:$0xff] %vm343_vm0, %v1362_v8  ;;  %v1370_v16 = vadd.f32 %v1567_v6, %v1369_v14  ;;  %v1365_v17 = vadd.f32 %v1815_v15, %v1567_v6  ;;  %v1819_v18 = vpop.f32.mrb[22].mxu1  ;;  %v1356_v19 = vpop.f32.mrb[51].mxu0 }
 0x4b0   : > { %1422 = vst.msk [vmem:[%s2151_s29 + $0x30] sm:$0xff] %vm343_vm0, %v1378_v12  ;;  %1416 = vst.msk [vmem:[%s2151_s29] sm:$0xff] %vm343_vm0, %v1354_v13  ;;  %v1381_v20 = vadd.f32 %v1819_v18, %v1567_v6  ;;  %v1357_v21 = vadd.f32 %v1567_v6, %v1356_v19  ;;  %v1372_v22 = vpop.f32.mrb[23].mxu1 }
 0x4b1   : > { %1420 = vst.msk [vmem:[%s2151_s29 + $0x20] sm:$0xff] %vm343_vm0, %v1370_v16  ;;  %1419 = vst.msk [vmem:[%s2151_s29 + $0x18] sm:$0xff] %vm343_vm0, %v1365_v17  ;;  %v1373_v23 = vadd.f32 %v1567_v6, %v1372_v22 }
 0x4b2   : > { %1423 = vst.msk [vmem:[%s2151_s29 + $0x38] sm:$0xff] %vm343_vm0, %v1381_v20  ;;  %1417 = vst.msk [vmem:[%s2151_s29 + $0x8] sm:$0xff] %vm343_vm0, %v1357_v21 }
 0x4b3   : > { %1421 = vst.msk [vmem:[%s2151_s29 + $0x28] sm:$0xff] %vm343_vm0, %v1373_v23 }
 0x4b5   : > { %v1822_v24 = vpop.f32.mrb[24].mxu1 }
 0x4b6   : > { %v1394_v25 = vadd.f32 %v1822_v24, %v1567_v6  ;;  %v1385_v26 = vpop.f32.mrb[25].mxu1 }
 0x4b7   : > { %v1386_v27 = vadd.f32 %v1567_v6, %v1385_v26  ;;  %v1823_v11 = vpop.f32.mrb[26].mxu1 }
 0x4b8   : > { %1426 = vst.msk [vmem:[%s2151_s29 + $0x50] sm:$0xff] %vm343_vm0, %v1394_v25  ;;  %v1397_v28 = vadd.f32 %v1823_v11, %v1567_v6  ;;  %v1388_v29 = vpop.f32.mrb[27].mxu1 }
 0x4b9   : > { %1424 = vst.msk [vmem:[%s2151_s29 + $0x40] sm:$0xff] %vm343_vm0, %v1386_v27  ;;  %v1389_v30 = vadd.f32 %v1567_v6, %v1388_v29 }
 0x4ba   : > { %1427 = vst.msk [vmem:[%s2151_s29 + $0x58] sm:$0xff] %vm343_vm0, %v1397_v28 }
 0x4bb   : > { %1425 = vst.msk [vmem:[%s2151_s29 + $0x48] sm:$0xff] %vm343_vm0, %v1389_v30 }
 0x4bd   : > { %v1826_v31 = vpop.f32.mrb[28].mxu1 }
 0x4be   : > { %v1410_v32 = vadd.f32 %v1826_v31, %v1567_v6  ;;  %v1401_v33 = vpop.f32.mrb[29].mxu1 }
 0x4bf   : > { %v1402_v34 = vadd.f32 %v1567_v6, %v1401_v33  ;;  %v1827_v35 = vpop.f32.mrb[30].mxu1 }
 0x4c0   : > { %1430 = vst.msk [vmem:[%s2151_s29 + $0x70] sm:$0xff] %vm343_vm0, %v1410_v32  ;;  %v1413_v36 = vadd.f32 %v1827_v35, %v1567_v6  ;;  %v1404_v37 = vpop.f32.mrb[31].mxu1 }
 0x4c1   : > { %1428 = vst.msk [vmem:[%s2151_s29 + $0x60] sm:$0xff] %vm343_vm0, %v1402_v34  ;;  %v1405_v38 = vadd.f32 %v1567_v6, %v1404_v37 }
 0x4c2   : > { %1431 = vst.msk [vmem:[%s2151_s29 + $0x78] sm:$0xff] %vm343_vm0, %v1413_v36 }
 0x4c3   : > { %1429 = vst.msk [vmem:[%s2151_s29 + $0x68] sm:$0xff] %vm343_vm0, %v1405_v38 }
 0x4c4 PF: > { %s17_s21 = sadd.s32 1, %s1955_s21  }
 0x4c5   : > { %p14_p3 = scmp.ge.s32.totalorder %s17_s21, 4  }
 0x4c7   :  { %16 = sbr.rel (!%p14_p3) target bundleno = 1 (0x1), region = 82 }
 0x4ce   :  { %1456 = vsyncpa [#allocation3], 1 }
 0x4cf   :  { %1458 = vsyncpa [#allocation3 + $0x1], 1 }

</bundles_post_ra>
